<compile_context>
chip_gen: v7x
topology: tpu7x:2x2x1
jax: 0.10.0
libtpu: 0.0.40
codegen_flags: <defaults>
</compile_context>

<pallas_src>
import math

import numpy as np
import jax
import jax.numpy as jnp
from jax.experimental import pallas as pl
from jax.experimental.pallas import tpu as pltpu  # noqa: F401

# ----------------------------- model config ---------------------------------
SRC_VOCAB = 50
D_MODEL = 32
N_LAYERS = 2
HEADS = 4
D_K = D_MODEL // HEADS
D_FF = 64            # FeedForward hidden (toy size; repo default is 2048)
EPS = 1e-6
B = 2
SEQ = 8
MAX_PE = 200

assert D_MODEL % HEADS == 0
assert D_MODEL % 8 == 0 and D_FF % 8 == 0

# ----------------------------- weight-slab layout ----------------------------
LANES = 128           # lane-padded slab width
V_PAD = 64            # embedding rows padded to a multiple of 8 (>= SRC_VOCAB)
assert SRC_VOCAB <= V_PAD

# per-layer row offsets (all block starts are 8-aligned)
R_NORM = 0                      # 4 rows: n1.alpha, n1.bias, n2.alpha, n2.bias
R_WQKV = 8                      # D_MODEL rows, lanes [0, 3*D_MODEL)
R_BQKV = R_WQKV + D_MODEL       # 40
R_WO = 48                       # D_MODEL rows, lanes [0, D_MODEL)
R_BO = R_WO + D_MODEL           # 80
R_W1 = 88                       # D_MODEL rows, lanes [0, D_FF)
R_B1 = R_W1 + D_MODEL           # 120
R_W2 = 128                      # D_FF rows, lanes [0, D_MODEL)
R_B2 = R_W2 + D_FF              # 192
LROWS = 200                     # rows per encoder layer

R_HNORM = N_LAYERS * LROWS      # 400: final Norm alpha / bias (2 rows)
R_OUT_W = R_HNORM + 2           # 402: out2 weight stored as one row
R_OUT_B = R_HNORM + 3           # 403: out2 bias in lane 0
R_EMB = R_HNORM + 8             # 408: embedding table (sqrt(d_model) pre-folded)
R_PE = R_EMB + V_PAD            # 472: positional encoding rows, tiled over batch


# ----------------------------- Pallas kernel ---------------------------------
def _norm(x, a, b):
    # PyTorch Norm: alpha * (x - mean) / (std + eps) + bias, std unbiased (ddof=1).
    # Per-element divide replaced by exact reciprocal on the (N,1) column.
    mu = jnp.mean(x, axis=-1, keepdims=True)
    xc = x - mu
    var = jnp.sum(xc * xc, axis=-1, keepdims=True) / (x.shape[-1] - 1)
    inv = 1.0 / (jnp.sqrt(var) + EPS)
    return a * (xc * inv) + b


def _make_kernel(seq):
    inv_sqrt_dk = 1.0 / math.sqrt(D_K)

    def kernel(src_ref, kmask_ref, w_ref, o_ref):
        n = src_ref.shape[0]          # B * S flattened rows (static)
        bsz = n // seq

        # ---- Embedder + PositionalEncoder (dropout = identity) -------------
        # Token gather as a one-hot matmul: exactly one 1.0 per row, so the
        # result is bitwise-equal to embed[src]*sqrt(d_model) (scale pre-folded
        # into the slab's embedding rows).
        tok = src_ref[...]                                              # (n, 1) int32
        onehot = (tok == jax.lax.broadcasted_iota(jnp.int32, (n, V_PAD), 1)
                  ).astype(jnp.float32)                                 # (n, V_PAD)
        emb = w_ref[R_EMB:R_EMB + V_PAD, :D_MODEL]                      # (V_PAD, D)
        pe = w_ref[R_PE:R_PE + n, :D_MODEL]                             # (n, D), batch-tiled
        x = jnp.dot(onehot, emb, preferred_element_type=jnp.float32) + pe

        # ---- attention validity: src_mask keys AND same-batch block-diagonal ----
        # Built without integer vector division: block-membership matrices
        # (n, B) and (B, n) from iota comparisons, combined by one tiny matmul.
        key_ok = (kmask_ref[...] != 0.0).astype(jnp.float32)            # (1, n)
        r_idx = jax.lax.broadcasted_iota(jnp.int32, (n, bsz), 0)
        r_lo = jax.lax.broadcasted_iota(jnp.int32, (n, bsz), 1) * seq
        m_rows = ((r_idx >= r_lo) & (r_idx < r_lo + seq)).astype(jnp.float32)   # (n, B)
        c_idx = jax.lax.broadcasted_iota(jnp.int32, (bsz, n), 1)
        c_lo = jax.lax.broadcasted_iota(jnp.int32, (bsz, n), 0) * seq
        m_cols = ((c_idx >= c_lo) & (c_idx < c_lo + seq)).astype(jnp.float32)   # (B, n)
        m_cols = m_cols * key_ok                                         # fold key validity
        valid = jnp.dot(m_rows, m_cols,
                        preferred_element_type=jnp.float32) > 0.5        # (n, n) bool

        for l in range(N_LAYERS):                 # static unroll over layers
            base = l * LROWS
            n1a = w_ref[base + R_NORM + 0:base + R_NORM + 1, :D_MODEL]
            n1b = w_ref[base + R_NORM + 1:base + R_NORM + 2, :D_MODEL]
            n2a = w_ref[base + R_NORM + 2:base + R_NORM + 3, :D_MODEL]
            n2b = w_ref[base + R_NORM + 3:base + R_NORM + 4, :D_MODEL]
            wqkv = w_ref[base + R_WQKV:base + R_WQKV + D_MODEL, :3 * D_MODEL]   # (D, 3D)
            bqkv = w_ref[base + R_BQKV:base + R_BQKV + 1, :3 * D_MODEL]         # (1, 3D)
            wo = w_ref[base + R_WO:base + R_WO + D_MODEL, :D_MODEL]             # (D, D)
            bo = w_ref[base + R_BO:base + R_BO + 1, :D_MODEL]
            w1 = w_ref[base + R_W1:base + R_W1 + D_MODEL, :D_FF]                # (D, D_FF)
            b1 = w_ref[base + R_B1:base + R_B1 + 1, :D_FF]
            w2 = w_ref[base + R_W2:base + R_W2 + D_FF, :D_MODEL]                # (D_FF, D)
            b2 = w_ref[base + R_B2:base + R_B2 + 1, :D_MODEL]

            # --- self-attention sublayer (pre-norm + residual) ---
            x2 = _norm(x, n1a, n1b)
            # ONE wide QKV matmul: (n, 32) x (32, 96); no per-head broadcast.
            qkv = jnp.dot(x2, wqkv, preferred_element_type=jnp.float32) + bqkv  # (n, 3D)
            q = jnp.stack([qkv[:, h * D_K:(h + 1) * D_K]
                           for h in range(HEADS)], axis=0)                       # (H, n, dk)
            k = jnp.stack([qkv[:, D_MODEL + h * D_K:D_MODEL + (h + 1) * D_K]
                           for h in range(HEADS)], axis=0)
            v = jnp.stack([qkv[:, 2 * D_MODEL + h * D_K:2 * D_MODEL + (h + 1) * D_K]
                           for h in range(HEADS)], axis=0)
            s = jnp.einsum('hqd,hkd->hqk', q, k,
                           preferred_element_type=jnp.float32) * inv_sqrt_dk     # (H, n, n)
            # masked_fill(mask==0, -1e9): masked entries underflow to exactly 0
            # after softmax (same as PyTorch).
            s = jnp.where(valid, s, -1e9)
            s = s - jnp.max(s, axis=-1, keepdims=True)
            e = jnp.exp(s)
            p = e * (1.0 / jnp.sum(e, axis=-1, keepdims=True))                   # softmax
            ctx = jnp.einsum('hqk,hkd->hqd', p, v,
                             preferred_element_type=jnp.float32)                 # (H, n, dk)
            # multi-head concat (head-major, matching PyTorch .view) folded into
            # ONE (n, 32) x (32, 32) output projection.
            ctx_c = jnp.concatenate([ctx[h] for h in range(HEADS)], axis=-1)     # (n, D)
            x = x + jnp.dot(ctx_c, wo, preferred_element_type=jnp.float32) + bo

            # --- feed-forward sublayer (pre-norm + residual) ---
            x2 = _norm(x, n2a, n2b)
            h1 = jnp.maximum(
                jnp.dot(x2, w1, preferred_element_type=jnp.float32) + b1, 0.0)
            x = x + jnp.dot(h1, w2, preferred_element_type=jnp.float32) + b2

        # --- head: final Norm + mean(seq) + Linear(D,1) + mean(batch) + sigmoid ---
        ha = w_ref[R_HNORM:R_HNORM + 1, :D_MODEL]
        hb = w_ref[R_HNORM + 1:R_HNORM + 2, :D_MODEL]
        wout = w_ref[R_OUT_W:R_OUT_W + 1, :D_MODEL]                      # (1, D)
        bout = w_ref[R_OUT_B:R_OUT_B + 1, 0:1]                           # (1, 1)
        xn = _norm(x, ha, hb)
        # mean over seq then over batch == mean over all B*S rows (equal seq lens)
        g = jnp.mean(xn, axis=0, keepdims=True)                          # (1, D)
        y = jnp.sum(g * wout, axis=-1, keepdims=True) + bout             # (1, 1)
        o_ref[...] = jax.nn.sigmoid(y)

    return kernel


# ----------------------------- wrapper ---------------------------------------
def transformer_forward(slab, src, src_mask):
    """Whole forward in one grid-less pallas_call; only trivial reshapes outside."""
    bsz, seq = src.shape
    n = bsz * seq
    src_ids = src.reshape(n, 1).astype(jnp.int32)
    key_mask = src_mask[:, 0, :].reshape(1, n).astype(jnp.float32)

    flops = (2 * n * V_PAD * D_MODEL
             + N_LAYERS * (2 * n * D_MODEL * 3 * D_MODEL     # fused QKV
                           + 4 * HEADS * n * n * D_K         # scores + PV
                           + 2 * n * D_MODEL * D_MODEL       # output projection
                           + 4 * n * D_MODEL * D_FF))        # FFN
    bytes_accessed = 4 * (int(slab.size) + 2 * n + n) + 4

    y = pl.pallas_call(
        _make_kernel(seq),
        out_shape=jax.ShapeDtypeStruct((1, 1), jnp.float32),
        cost_estimate=pl.CostEstimate(
            flops=int(flops),
            transcendentals=int(N_LAYERS * HEADS * n * n + 8),
            bytes_accessed=int(bytes_accessed)),
    )(src_ids, key_mask, slab)
    return y[:, 0]                                                       # (1,)


# ----------------------------- parameter init / packing ----------------------
def init_params(key):
    params = {}
    keys = iter(jax.random.split(key, 64))

    def dense(din, dout):
        w = 0.05 * jax.random.normal(next(keys), (din, dout), jnp.float32)
        b = 0.05 * jax.random.normal(next(keys), (1, dout), jnp.float32)
        return w, b

    def norm_pair():
        a = 1.0 + 0.05 * jax.random.normal(next(keys), (1, D_MODEL), jnp.float32)
        b = 0.05 * jax.random.normal(next(keys), (1, D_MODEL), jnp.float32)
        return a, b

    params["embed"] = 0.05 * jax.random.normal(next(keys), (SRC_VOCAB, D_MODEL),
                                               jnp.float32)

    layers = []
    for _ in range(N_LAYERS):
        wq, bq = dense(D_MODEL, D_MODEL)
        wk, bk = dense(D_MODEL, D_MODEL)
        wv, bv = dense(D_MODEL, D_MODEL)
        wo, bo = dense(D_MODEL, D_MODEL)
        w1, b1 = dense(D_MODEL, D_FF)
        w2, b2 = dense(D_FF, D_MODEL)
        n1a, n1b = norm_pair()
        n2a, n2b = norm_pair()
        layers.append([n1a, n1b, wq, bq, wk, bk, wv, bv, wo, bo,
                       n2a, n2b, w1, b1, w2, b2])
    params["layers"] = layers

    params["norm_a"], params["norm_b"] = norm_pair()
    params["out2_w"], params["out2_b"] = dense(D_MODEL, 1)
    return params


def pack_params(params, pe, bsz, seq):
    """Pack every parameter + embedding + PE into ONE (rows, 128) f32 slab."""
    n = bsz * seq
    rows = R_PE + ((n + 7) // 8) * 8
    slab = np.zeros((rows, LANES), np.float32)

    for l, (n1a, n1b, wq, bq, wk, bk, wv, bv, wo, bo,
            n2a, n2b, w1, b1, w2, b2) in enumerate(params["layers"]):
        base = l * LROWS
        slab[base + R_NORM + 0, :D_MODEL] = np.asarray(n1a).reshape(-1)
        slab[base + R_NORM + 1, :D_MODEL] = np.asarray(n1b).reshape(-1)
        slab[base + R_NORM + 2, :D_MODEL] = np.asarray(n2a).reshape(-1)
        slab[base + R_NORM + 3, :D_MODEL] = np.asarray(n2b).reshape(-1)
        wqkv = np.concatenate([np.asarray(wq), np.asarray(wk), np.asarray(wv)], axis=1)
        bqkv = np.concatenate([np.asarray(bq), np.asarray(bk), np.asarray(bv)], axis=1)
        slab[base + R_WQKV:base + R_WQKV + D_MODEL, :3 * D_MODEL] = wqkv
        slab[base + R_BQKV, :3 * D_MODEL] = bqkv.reshape(-1)
        slab[base + R_WO:base + R_WO + D_MODEL, :D_MODEL] = np.asarray(wo)
        slab[base + R_BO, :D_MODEL] = np.asarray(bo).reshape(-1)
        slab[base + R_W1:base + R_W1 + D_MODEL, :D_FF] = np.asarray(w1)
        slab[base + R_B1, :D_FF] = np.asarray(b1).reshape(-1)
        slab[base + R_W2:base + R_W2 + D_FF, :D_MODEL] = np.asarray(w2)
        slab[base + R_B2, :D_MODEL] = np.asarray(b2).reshape(-1)

    slab[R_HNORM + 0, :D_MODEL] = np.asarray(params["norm_a"]).reshape(-1)
    slab[R_HNORM + 1, :D_MODEL] = np.asarray(params["norm_b"]).reshape(-1)
    slab[R_OUT_W, :D_MODEL] = np.asarray(params["out2_w"]).reshape(-1)
    slab[R_OUT_B, 0] = float(np.asarray(params["out2_b"]).reshape(()))
    # Embedding with sqrt(d_model) pre-folded (exact: scale commutes with the
    # one-hot gather); rows [SRC_VOCAB, V_PAD) stay zero.
    slab[R_EMB:R_EMB + SRC_VOCAB, :D_MODEL] = (
        np.asarray(params["embed"]) * math.sqrt(D_MODEL))
    # Positional-encoding rows tiled over batch so row b*seq+s carries pe[s].
    slab[R_PE:R_PE + n, :D_MODEL] = np.tile(np.asarray(pe)[:seq], (bsz, 1))
    return jnp.asarray(slab)


def positional_encoding(max_len, d_model):
    pe = np.zeros((max_len, d_model), np.float32)
    for pos in range(max_len):
        for i in range(0, d_model, 2):
            pe[pos, i] = math.sin(pos / (10000 ** ((2 * i) / d_model)))
            pe[pos, i + 1] = math.cos(pos / (10000 ** ((2 * (i + 1)) / d_model)))
    return jnp.asarray(pe)


# ----------------------------- pure-JAX reference ----------------------------
def reference_forward(params, src, src_mask, pe):
    def norm(x, a, b):
        mu = x.mean(-1, keepdims=True)
        sd = jnp.sqrt(((x - mu) ** 2).sum(-1, keepdims=True) / (x.shape[-1] - 1))
        return a * (x - mu) / (sd + EPS) + b

    x = params["embed"][src] * math.sqrt(D_MODEL) + pe[None, :src.shape[1], :]
    for (n1a, n1b, wq, bq, wk, bk, wv, bv, wo, bo,
         n2a, n2b, w1, b1, w2, b2) in params["layers"]:
        x2 = norm(x, n1a, n1b)
        q = x2 @ wq + bq
        k = x2 @ wk + bk
        v = x2 @ wv + bv
        qh = q.reshape(B, SEQ, HEADS, D_K).transpose(0, 2, 1, 3)
        kh = k.reshape(B, SEQ, HEADS, D_K).transpose(0, 2, 1, 3)
        vh = v.reshape(B, SEQ, HEADS, D_K).transpose(0, 2, 1, 3)
        s = jnp.einsum("bhqd,bhkd->bhqk", qh, kh) / math.sqrt(D_K)
        s = jnp.where(src_mask[:, None, :, :] == 0.0, -1e9, s)
        p = jax.nn.softmax(s, axis=-1)
        o = jnp.einsum("bhqk,bhkd->bhqd", p, vh).transpose(0, 2, 1, 3).reshape(B, SEQ, D_MODEL)
        x = x + (o @ wo + bo)
        x2 = norm(x, n2a, n2b)
        x = x + (jnp.maximum(x2 @ w1 + b1, 0.0) @ w2 + b2)
    xn = norm(x, params["norm_a"], params["norm_b"])
    pooled = xn.mean(axis=1)
    y = pooled @ params["out2_w"] + params["out2_b"]
    return jax.nn.sigmoid(y.mean(axis=0))


# ----------------------------- main -------------------------------------------
if __name__ == "__main__":
    key = jax.random.PRNGKey(0)
    k_param, k_src = jax.random.split(key)

    params = init_params(k_param)
    pe = positional_encoding(MAX_PE, D_MODEL)
    slab = pack_params(params, pe, B, SEQ)      # one-time weight packing

    src = jax.random.randint(k_src, (B, SEQ), 0, SRC_VOCAB, dtype=jnp.int32)
    src_mask = jnp.ones((B, 1, SEQ), jnp.float32)   # all positions valid

    fwd = jax.jit(transformer_forward)
    y = jax.block_until_ready(fwd(slab, src, src_mask))

    y_ref = reference_forward(params, src, src_mask, pe)
    assert y.shape == (1,)
    assert jnp.allclose(y, y_ref, atol=1e-5, rtol=1e-5), (y, y_ref)

    print("KERNEL_OK")
</pallas_src>

<mosaic_0001>
module attributes {stable_mosaic.version = 11 : i64} {
  func.func @kernel(%arg0: memref<16x1xi32, #tpu.memory_space<vmem>>, %arg1: memref<1x16xf32, #tpu.memory_space<vmem>>, %arg2: memref<488x128xf32, #tpu.memory_space<vmem>>, %arg3: memref<1x1xf32, #tpu.memory_space<vmem>>) attributes {dimension_semantics = [], scalar_prefetch = 0 : i64, scratch_operands = 0 : i64, tpu.core_type = #tpu.core_type<tc>} {
    %c0 = arith.constant 0 : index
    %c0_0 = arith.constant 0 : index
    %0 = vector.load %arg0[%c0, %c0_0] : memref<16x1xi32, #tpu.memory_space<vmem>>, vector<16x1xi32>
    %1 = tpu.iota {dimensions = array<i32: 1>} : vector<16x64xi32>
    %2 = vector.broadcast %0 : vector<16x1xi32> to vector<16x64xi32>
    %3 = arith.cmpi eq, %2, %1 : vector<16x64xi32>
    %4 = arith.extui %3 : vector<16x64xi1> to vector<16x64xi32>
    %5 = arith.sitofp %4 : vector<16x64xi32> to vector<16x64xf32>
    %c408 = arith.constant 408 : index
    %c0_1 = arith.constant 0 : index
    %6 = vector.load %arg2[%c408, %c0_1] : memref<488x128xf32, #tpu.memory_space<vmem>>, vector<64x32xf32>
    %c472 = arith.constant 472 : index
    %c0_2 = arith.constant 0 : index
    %7 = vector.load %arg2[%c472, %c0_2] : memref<488x128xf32, #tpu.memory_space<vmem>>, vector<16x32xf32>
    %cst = arith.constant dense<0.000000e+00> : vector<16x32xf32>
    %8 = tpu.matmul %5, %6, %cst {dimension_numbers = #tpu.dot_dimension_numbers<[1], [0], [0], [1], [0, 0, 1, 1], [], []>} : vector<16x64xf32>, vector<64x32xf32>, vector<16x32xf32> -> vector<16x32xf32>
    %9 = arith.addf %8, %7 : vector<16x32xf32>
    %c0_3 = arith.constant 0 : index
    %c0_4 = arith.constant 0 : index
    %10 = vector.load %arg1[%c0_3, %c0_4] : memref<1x16xf32, #tpu.memory_space<vmem>>, vector<1x16xf32>
    %cst_5 = arith.constant 0.000000e+00 : f32
    %11 = vector.broadcast %cst_5 : f32 to vector<1x16xf32>
    %12 = arith.cmpf one, %10, %11 : vector<1x16xf32>
    %13 = arith.extui %12 : vector<1x16xi1> to vector<1x16xi32>
    %14 = arith.sitofp %13 : vector<1x16xi32> to vector<1x16xf32>
    %15 = tpu.iota {dimensions = array<i32: 0>} : vector<16x2xi32>
    %16 = tpu.iota {dimensions = array<i32: 1>} : vector<16x2xi32>
    %c8_i32 = arith.constant 8 : i32
    %17 = vector.broadcast %c8_i32 : i32 to vector<16x2xi32>
    %18 = arith.muli %16, %17 : vector<16x2xi32>
    %19 = arith.cmpi sge, %15, %18 : vector<16x2xi32>
    %c8_i32_6 = arith.constant 8 : i32
    %20 = vector.broadcast %c8_i32_6 : i32 to vector<16x2xi32>
    %21 = arith.addi %18, %20 : vector<16x2xi32>
    %22 = arith.cmpi slt, %15, %21 : vector<16x2xi32>
    %23 = arith.andi %19, %22 : vector<16x2xi1>
    %24 = arith.extui %23 : vector<16x2xi1> to vector<16x2xi32>
    %25 = arith.sitofp %24 : vector<16x2xi32> to vector<16x2xf32>
    %26 = tpu.iota {dimensions = array<i32: 1>} : vector<2x16xi32>
    %27 = tpu.iota {dimensions = array<i32: 0>} : vector<2x16xi32>
    %c8_i32_7 = arith.constant 8 : i32
    %28 = vector.broadcast %c8_i32_7 : i32 to vector<2x16xi32>
    %29 = arith.muli %27, %28 : vector<2x16xi32>
    %30 = arith.cmpi sge, %26, %29 : vector<2x16xi32>
    %c8_i32_8 = arith.constant 8 : i32
    %31 = vector.broadcast %c8_i32_8 : i32 to vector<2x16xi32>
    %32 = arith.addi %29, %31 : vector<2x16xi32>
    %33 = arith.cmpi slt, %26, %32 : vector<2x16xi32>
    %34 = arith.andi %30, %33 : vector<2x16xi1>
    %35 = arith.extui %34 : vector<2x16xi1> to vector<2x16xi32>
    %36 = arith.sitofp %35 : vector<2x16xi32> to vector<2x16xf32>
    %37 = vector.broadcast %14 : vector<1x16xf32> to vector<2x16xf32>
    %38 = arith.mulf %36, %37 : vector<2x16xf32>
    %cst_9 = arith.constant dense<0.000000e+00> : vector<16x16xf32>
    %39 = tpu.matmul %25, %38, %cst_9 {dimension_numbers = #tpu.dot_dimension_numbers<[1], [0], [0], [1], [0, 0, 1, 1], [], []>} : vector<16x2xf32>, vector<2x16xf32>, vector<16x16xf32> -> vector<16x16xf32>
    %cst_10 = arith.constant 5.000000e-01 : f32
    %40 = vector.broadcast %cst_10 : f32 to vector<16x16xf32>
    %41 = arith.cmpf ogt, %39, %40 : vector<16x16xf32>
    %c0_11 = arith.constant 0 : index
    %c0_12 = arith.constant 0 : index
    %42 = vector.load %arg2[%c0_11, %c0_12] : memref<488x128xf32, #tpu.memory_space<vmem>>, vector<1x32xf32>
    %c1 = arith.constant 1 : index
    %c0_13 = arith.constant 0 : index
    %43 = vector.load %arg2[%c1, %c0_13] : memref<488x128xf32, #tpu.memory_space<vmem>>, vector<1x32xf32>
    %c2 = arith.constant 2 : index
    %c0_14 = arith.constant 0 : index
    %44 = vector.load %arg2[%c2, %c0_14] : memref<488x128xf32, #tpu.memory_space<vmem>>, vector<1x32xf32>
    %c3 = arith.constant 3 : index
    %c0_15 = arith.constant 0 : index
    %45 = vector.load %arg2[%c3, %c0_15] : memref<488x128xf32, #tpu.memory_space<vmem>>, vector<1x32xf32>
    %c8 = arith.constant 8 : index
    %c0_16 = arith.constant 0 : index
    %46 = vector.load %arg2[%c8, %c0_16] : memref<488x128xf32, #tpu.memory_space<vmem>>, vector<32x96xf32>
    %c40 = arith.constant 40 : index
    %c0_17 = arith.constant 0 : index
    %47 = vector.load %arg2[%c40, %c0_17] : memref<488x128xf32, #tpu.memory_space<vmem>>, vector<1x96xf32>
    %c48 = arith.constant 48 : index
    %c0_18 = arith.constant 0 : index
    %48 = vector.load %arg2[%c48, %c0_18] : memref<488x128xf32, #tpu.memory_space<vmem>>, vector<32x32xf32>
    %c80 = arith.constant 80 : index
    %c0_19 = arith.constant 0 : index
    %49 = vector.load %arg2[%c80, %c0_19] : memref<488x128xf32, #tpu.memory_space<vmem>>, vector<1x32xf32>
    %c88 = arith.constant 88 : index
    %c0_20 = arith.constant 0 : index
    %50 = vector.load %arg2[%c88, %c0_20] : memref<488x128xf32, #tpu.memory_space<vmem>>, vector<32x64xf32>
    %c120 = arith.constant 120 : index
    %c0_21 = arith.constant 0 : index
    %51 = vector.load %arg2[%c120, %c0_21] : memref<488x128xf32, #tpu.memory_space<vmem>>, vector<1x64xf32>
    %c128 = arith.constant 128 : index
    %c0_22 = arith.constant 0 : index
    %52 = vector.load %arg2[%c128, %c0_22] : memref<488x128xf32, #tpu.memory_space<vmem>>, vector<64x32xf32>
    %c192 = arith.constant 192 : index
    %c0_23 = arith.constant 0 : index
    %53 = vector.load %arg2[%c192, %c0_23] : memref<488x128xf32, #tpu.memory_space<vmem>>, vector<1x32xf32>
    %cst_24 = arith.constant dense<0.000000e+00> : vector<16xf32>
    %54 = vector.multi_reduction <add>, %9, %cst_24 [1] : vector<16x32xf32> to vector<16xf32>
    %55 = vector.shape_cast %54 : vector<16xf32> to vector<16x1xf32>
    %cst_25 = arith.constant 3.200000e+01 : f32
    %56 = vector.broadcast %cst_25 : f32 to vector<16x1xf32>
    %57 = arith.divf %55, %56 : vector<16x1xf32>
    %58 = vector.broadcast %57 : vector<16x1xf32> to vector<16x32xf32>
    %59 = arith.subf %9, %58 : vector<16x32xf32>
    %60 = arith.mulf %59, %59 : vector<16x32xf32>
    %cst_26 = arith.constant dense<0.000000e+00> : vector<16xf32>
    %61 = vector.multi_reduction <add>, %60, %cst_26 [1] : vector<16x32xf32> to vector<16xf32>
    %62 = vector.shape_cast %61 : vector<16xf32> to vector<16x1xf32>
    %cst_27 = arith.constant 3.100000e+01 : f32
    %63 = vector.broadcast %cst_27 : f32 to vector<16x1xf32>
    %64 = arith.divf %62, %63 : vector<16x1xf32>
    %65 = math.sqrt %64 : vector<16x1xf32>
    %cst_28 = arith.constant 9.99999997E-7 : f32
    %66 = vector.broadcast %cst_28 : f32 to vector<16x1xf32>
    %67 = arith.addf %65, %66 : vector<16x1xf32>
    %cst_29 = arith.constant 1.000000e+00 : f32
    %68 = vector.broadcast %cst_29 : f32 to vector<16x1xf32>
    %69 = arith.divf %68, %67 : vector<16x1xf32>
    %70 = vector.broadcast %69 : vector<16x1xf32> to vector<16x32xf32>
    %71 = arith.mulf %59, %70 : vector<16x32xf32>
    %72 = vector.broadcast %42 : vector<1x32xf32> to vector<16x32xf32>
    %73 = arith.mulf %72, %71 : vector<16x32xf32>
    %74 = vector.broadcast %43 : vector<1x32xf32> to vector<16x32xf32>
    %75 = arith.addf %73, %74 : vector<16x32xf32>
    %cst_30 = arith.constant dense<0.000000e+00> : vector<16x96xf32>
    %76 = tpu.matmul %75, %46, %cst_30 {dimension_numbers = #tpu.dot_dimension_numbers<[1], [0], [0], [1], [0, 0, 1, 1], [], []>} : vector<16x32xf32>, vector<32x96xf32>, vector<16x96xf32> -> vector<16x96xf32>
    %77 = vector.broadcast %47 : vector<1x96xf32> to vector<16x96xf32>
    %78 = arith.addf %76, %77 : vector<16x96xf32>
    %79 = vector.extract_strided_slice %78 {offsets = [0, 0], sizes = [16, 8], strides = [1, 1]} : vector<16x96xf32> to vector<16x8xf32>
    %80 = vector.extract_strided_slice %78 {offsets = [0, 8], sizes = [16, 8], strides = [1, 1]} : vector<16x96xf32> to vector<16x8xf32>
    %81 = vector.extract_strided_slice %78 {offsets = [0, 16], sizes = [16, 8], strides = [1, 1]} : vector<16x96xf32> to vector<16x8xf32>
    %82 = vector.extract_strided_slice %78 {offsets = [0, 24], sizes = [16, 8], strides = [1, 1]} : vector<16x96xf32> to vector<16x8xf32>
    %83 = vector.shape_cast %79 : vector<16x8xf32> to vector<1x16x8xf32>
    %84 = vector.shape_cast %80 : vector<16x8xf32> to vector<1x16x8xf32>
    %85 = vector.shape_cast %81 : vector<16x8xf32> to vector<1x16x8xf32>
    %86 = vector.shape_cast %82 : vector<16x8xf32> to vector<1x16x8xf32>
    %87 = tpu.concatenate %83, %84, %85, %86 in 0 : vector<1x16x8xf32>, vector<1x16x8xf32>, vector<1x16x8xf32>, vector<1x16x8xf32> -> vector<4x16x8xf32>
    %88 = vector.extract_strided_slice %78 {offsets = [0, 32], sizes = [16, 8], strides = [1, 1]} : vector<16x96xf32> to vector<16x8xf32>
    %89 = vector.extract_strided_slice %78 {offsets = [0, 40], sizes = [16, 8], strides = [1, 1]} : vector<16x96xf32> to vector<16x8xf32>
    %90 = vector.extract_strided_slice %78 {offsets = [0, 48], sizes = [16, 8], strides = [1, 1]} : vector<16x96xf32> to vector<16x8xf32>
    %91 = vector.extract_strided_slice %78 {offsets = [0, 56], sizes = [16, 8], strides = [1, 1]} : vector<16x96xf32> to vector<16x8xf32>
    %92 = vector.shape_cast %88 : vector<16x8xf32> to vector<1x16x8xf32>
    %93 = vector.shape_cast %89 : vector<16x8xf32> to vector<1x16x8xf32>
    %94 = vector.shape_cast %90 : vector<16x8xf32> to vector<1x16x8xf32>
    %95 = vector.shape_cast %91 : vector<16x8xf32> to vector<1x16x8xf32>
    %96 = tpu.concatenate %92, %93, %94, %95 in 0 : vector<1x16x8xf32>, vector<1x16x8xf32>, vector<1x16x8xf32>, vector<1x16x8xf32> -> vector<4x16x8xf32>
    %97 = vector.extract_strided_slice %78 {offsets = [0, 64], sizes = [16, 8], strides = [1, 1]} : vector<16x96xf32> to vector<16x8xf32>
    %98 = vector.extract_strided_slice %78 {offsets = [0, 72], sizes = [16, 8], strides = [1, 1]} : vector<16x96xf32> to vector<16x8xf32>
    %99 = vector.extract_strided_slice %78 {offsets = [0, 80], sizes = [16, 8], strides = [1, 1]} : vector<16x96xf32> to vector<16x8xf32>
    %100 = vector.extract_strided_slice %78 {offsets = [0, 88], sizes = [16, 8], strides = [1, 1]} : vector<16x96xf32> to vector<16x8xf32>
    %101 = vector.shape_cast %97 : vector<16x8xf32> to vector<1x16x8xf32>
    %102 = vector.shape_cast %98 : vector<16x8xf32> to vector<1x16x8xf32>
    %103 = vector.shape_cast %99 : vector<16x8xf32> to vector<1x16x8xf32>
    %104 = vector.shape_cast %100 : vector<16x8xf32> to vector<1x16x8xf32>
    %105 = tpu.concatenate %101, %102, %103, %104 in 0 : vector<1x16x8xf32>, vector<1x16x8xf32>, vector<1x16x8xf32>, vector<1x16x8xf32> -> vector<4x16x8xf32>
    "tpu.trace_start"() <{level = 10 : i32, message = "hqd,hkd->hqk"}> : () -> ()
    %cst_31 = arith.constant dense<0.000000e+00> : vector<4x16x16xf32>
    %106 = tpu.matmul %87, %96, %cst_31 {dimension_numbers = #tpu.dot_dimension_numbers<[2], [2], [1], [1], [0, 0, 0, 1, 1, 1], [0], [0]>} : vector<4x16x8xf32>, vector<4x16x8xf32>, vector<4x16x16xf32> -> vector<4x16x16xf32>
    "tpu.trace_stop"() : () -> ()
    %cst_32 = arith.constant 0.353553385 : f32
    %107 = vector.broadcast %cst_32 : f32 to vector<4x16x16xf32>
    %108 = arith.mulf %106, %107 : vector<4x16x16xf32>
    %cst_33 = arith.constant -1.000000e+09 : f32
    %109 = vector.shape_cast %41 : vector<16x16xi1> to vector<1x16x16xi1>
    %110 = vector.broadcast %109 : vector<1x16x16xi1> to vector<4x16x16xi1>
    %111 = vector.broadcast %cst_33 : f32 to vector<4x16x16xf32>
    %112 = arith.select %110, %108, %111 : vector<4x16x16xi1>, vector<4x16x16xf32>
    %cst_34 = arith.constant dense<0xFF800000> : vector<4x16xf32>
    %113 = vector.multi_reduction <maximumf>, %112, %cst_34 [2] : vector<4x16x16xf32> to vector<4x16xf32>
    %114 = vector.shape_cast %113 : vector<4x16xf32> to vector<4x16x1xf32>
    %115 = vector.broadcast %114 : vector<4x16x1xf32> to vector<4x16x16xf32>
    %116 = arith.subf %112, %115 : vector<4x16x16xf32>
    %117 = math.exp %116 : vector<4x16x16xf32>
    %cst_35 = arith.constant dense<0.000000e+00> : vector<4x16xf32>
    %118 = vector.multi_reduction <add>, %117, %cst_35 [2] : vector<4x16x16xf32> to vector<4x16xf32>
    %119 = vector.shape_cast %118 : vector<4x16xf32> to vector<4x16x1xf32>
    %cst_36 = arith.constant 1.000000e+00 : f32
    %120 = vector.broadcast %cst_36 : f32 to vector<4x16x1xf32>
    %121 = arith.divf %120, %119 : vector<4x16x1xf32>
    %122 = vector.broadcast %121 : vector<4x16x1xf32> to vector<4x16x16xf32>
    %123 = arith.mulf %117, %122 : vector<4x16x16xf32>
    "tpu.trace_start"() <{level = 10 : i32, message = "hqk,hkd->hqd"}> : () -> ()
    %cst_37 = arith.constant dense<0.000000e+00> : vector<4x16x8xf32>
    %124 = tpu.matmul %123, %105, %cst_37 {dimension_numbers = #tpu.dot_dimension_numbers<[2], [1], [1], [2], [0, 0, 0, 1, 1, 2], [0], [0]>} : vector<4x16x16xf32>, vector<4x16x8xf32>, vector<4x16x8xf32> -> vector<4x16x8xf32>
    "tpu.trace_stop"() : () -> ()
    %125 = vector.extract_strided_slice %124 {offsets = [0, 0, 0], sizes = [1, 16, 8], strides = [1, 1, 1]} : vector<4x16x8xf32> to vector<1x16x8xf32>
    %126 = vector.shape_cast %125 : vector<1x16x8xf32> to vector<16x8xf32>
    %127 = vector.extract_strided_slice %124 {offsets = [1, 0, 0], sizes = [1, 16, 8], strides = [1, 1, 1]} : vector<4x16x8xf32> to vector<1x16x8xf32>
    %128 = vector.shape_cast %127 : vector<1x16x8xf32> to vector<16x8xf32>
    %129 = vector.extract_strided_slice %124 {offsets = [2, 0, 0], sizes = [1, 16, 8], strides = [1, 1, 1]} : vector<4x16x8xf32> to vector<1x16x8xf32>
    %130 = vector.shape_cast %129 : vector<1x16x8xf32> to vector<16x8xf32>
    %131 = vector.extract_strided_slice %124 {offsets = [3, 0, 0], sizes = [1, 16, 8], strides = [1, 1, 1]} : vector<4x16x8xf32> to vector<1x16x8xf32>
    %132 = vector.shape_cast %131 : vector<1x16x8xf32> to vector<16x8xf32>
    %133 = tpu.concatenate %126, %128, %130, %132 in 1 : vector<16x8xf32>, vector<16x8xf32>, vector<16x8xf32>, vector<16x8xf32> -> vector<16x32xf32>
    %cst_38 = arith.constant dense<0.000000e+00> : vector<16x32xf32>
    %134 = tpu.matmul %133, %48, %cst_38 {dimension_numbers = #tpu.dot_dimension_numbers<[1], [0], [0], [1], [0, 0, 1, 1], [], []>} : vector<16x32xf32>, vector<32x32xf32>, vector<16x32xf32> -> vector<16x32xf32>
    %135 = arith.addf %9, %134 : vector<16x32xf32>
    %136 = vector.broadcast %49 : vector<1x32xf32> to vector<16x32xf32>
    %137 = arith.addf %135, %136 : vector<16x32xf32>
    %cst_39 = arith.constant dense<0.000000e+00> : vector<16xf32>
    %138 = vector.multi_reduction <add>, %137, %cst_39 [1] : vector<16x32xf32> to vector<16xf32>
    %139 = vector.shape_cast %138 : vector<16xf32> to vector<16x1xf32>
    %cst_40 = arith.constant 3.200000e+01 : f32
    %140 = vector.broadcast %cst_40 : f32 to vector<16x1xf32>
    %141 = arith.divf %139, %140 : vector<16x1xf32>
    %142 = vector.broadcast %141 : vector<16x1xf32> to vector<16x32xf32>
    %143 = arith.subf %137, %142 : vector<16x32xf32>
    %144 = arith.mulf %143, %143 : vector<16x32xf32>
    %cst_41 = arith.constant dense<0.000000e+00> : vector<16xf32>
    %145 = vector.multi_reduction <add>, %144, %cst_41 [1] : vector<16x32xf32> to vector<16xf32>
    %146 = vector.shape_cast %145 : vector<16xf32> to vector<16x1xf32>
    %cst_42 = arith.constant 3.100000e+01 : f32
    %147 = vector.broadcast %cst_42 : f32 to vector<16x1xf32>
    %148 = arith.divf %146, %147 : vector<16x1xf32>
    %149 = math.sqrt %148 : vector<16x1xf32>
    %cst_43 = arith.constant 9.99999997E-7 : f32
    %150 = vector.broadcast %cst_43 : f32 to vector<16x1xf32>
    %151 = arith.addf %149, %150 : vector<16x1xf32>
    %cst_44 = arith.constant 1.000000e+00 : f32
    %152 = vector.broadcast %cst_44 : f32 to vector<16x1xf32>
    %153 = arith.divf %152, %151 : vector<16x1xf32>
    %154 = vector.broadcast %153 : vector<16x1xf32> to vector<16x32xf32>
    %155 = arith.mulf %143, %154 : vector<16x32xf32>
    %156 = vector.broadcast %44 : vector<1x32xf32> to vector<16x32xf32>
    %157 = arith.mulf %156, %155 : vector<16x32xf32>
    %158 = vector.broadcast %45 : vector<1x32xf32> to vector<16x32xf32>
    %159 = arith.addf %157, %158 : vector<16x32xf32>
    %cst_45 = arith.constant dense<0.000000e+00> : vector<16x64xf32>
    %160 = tpu.matmul %159, %50, %cst_45 {dimension_numbers = #tpu.dot_dimension_numbers<[1], [0], [0], [1], [0, 0, 1, 1], [], []>} : vector<16x32xf32>, vector<32x64xf32>, vector<16x64xf32> -> vector<16x64xf32>
    %161 = vector.broadcast %51 : vector<1x64xf32> to vector<16x64xf32>
    %162 = arith.addf %160, %161 : vector<16x64xf32>
    %cst_46 = arith.constant 0.000000e+00 : f32
    %163 = vector.broadcast %cst_46 : f32 to vector<16x64xf32>
    %164 = arith.maximumf %162, %163 : vector<16x64xf32>
    %cst_47 = arith.constant dense<0.000000e+00> : vector<16x32xf32>
    %165 = tpu.matmul %164, %52, %cst_47 {dimension_numbers = #tpu.dot_dimension_numbers<[1], [0], [0], [1], [0, 0, 1, 1], [], []>} : vector<16x64xf32>, vector<64x32xf32>, vector<16x32xf32> -> vector<16x32xf32>
    %166 = arith.addf %137, %165 : vector<16x32xf32>
    %167 = vector.broadcast %53 : vector<1x32xf32> to vector<16x32xf32>
    %168 = arith.addf %166, %167 : vector<16x32xf32>
    %c200 = arith.constant 200 : index
    %c0_48 = arith.constant 0 : index
    %169 = vector.load %arg2[%c200, %c0_48] : memref<488x128xf32, #tpu.memory_space<vmem>>, vector<1x32xf32>
    %c201 = arith.constant 201 : index
    %c0_49 = arith.constant 0 : index
    %170 = vector.load %arg2[%c201, %c0_49] : memref<488x128xf32, #tpu.memory_space<vmem>>, vector<1x32xf32>
    %c202 = arith.constant 202 : index
    %c0_50 = arith.constant 0 : index
    %171 = vector.load %arg2[%c202, %c0_50] : memref<488x128xf32, #tpu.memory_space<vmem>>, vector<1x32xf32>
    %c203 = arith.constant 203 : index
    %c0_51 = arith.constant 0 : index
    %172 = vector.load %arg2[%c203, %c0_51] : memref<488x128xf32, #tpu.memory_space<vmem>>, vector<1x32xf32>
    %c208 = arith.constant 208 : index
    %c0_52 = arith.constant 0 : index
    %173 = vector.load %arg2[%c208, %c0_52] : memref<488x128xf32, #tpu.memory_space<vmem>>, vector<32x96xf32>
    %c240 = arith.constant 240 : index
    %c0_53 = arith.constant 0 : index
    %174 = vector.load %arg2[%c240, %c0_53] : memref<488x128xf32, #tpu.memory_space<vmem>>, vector<1x96xf32>
    %c248 = arith.constant 248 : index
    %c0_54 = arith.constant 0 : index
    %175 = vector.load %arg2[%c248, %c0_54] : memref<488x128xf32, #tpu.memory_space<vmem>>, vector<32x32xf32>
    %c280 = arith.constant 280 : index
    %c0_55 = arith.constant 0 : index
    %176 = vector.load %arg2[%c280, %c0_55] : memref<488x128xf32, #tpu.memory_space<vmem>>, vector<1x32xf32>
    %c288 = arith.constant 288 : index
    %c0_56 = arith.constant 0 : index
    %177 = vector.load %arg2[%c288, %c0_56] : memref<488x128xf32, #tpu.memory_space<vmem>>, vector<32x64xf32>
    %c320 = arith.constant 320 : index
    %c0_57 = arith.constant 0 : index
    %178 = vector.load %arg2[%c320, %c0_57] : memref<488x128xf32, #tpu.memory_space<vmem>>, vector<1x64xf32>
    %c328 = arith.constant 328 : index
    %c0_58 = arith.constant 0 : index
    %179 = vector.load %arg2[%c328, %c0_58] : memref<488x128xf32, #tpu.memory_space<vmem>>, vector<64x32xf32>
    %c392 = arith.constant 392 : index
    %c0_59 = arith.constant 0 : index
    %180 = vector.load %arg2[%c392, %c0_59] : memref<488x128xf32, #tpu.memory_space<vmem>>, vector<1x32xf32>
    %cst_60 = arith.constant dense<0.000000e+00> : vector<16xf32>
    %181 = vector.multi_reduction <add>, %168, %cst_60 [1] : vector<16x32xf32> to vector<16xf32>
    %182 = vector.shape_cast %181 : vector<16xf32> to vector<16x1xf32>
    %cst_61 = arith.constant 3.200000e+01 : f32
    %183 = vector.broadcast %cst_61 : f32 to vector<16x1xf32>
    %184 = arith.divf %182, %183 : vector<16x1xf32>
    %185 = vector.broadcast %184 : vector<16x1xf32> to vector<16x32xf32>
    %186 = arith.subf %168, %185 : vector<16x32xf32>
    %187 = arith.mulf %186, %186 : vector<16x32xf32>
    %cst_62 = arith.constant dense<0.000000e+00> : vector<16xf32>
    %188 = vector.multi_reduction <add>, %187, %cst_62 [1] : vector<16x32xf32> to vector<16xf32>
    %189 = vector.shape_cast %188 : vector<16xf32> to vector<16x1xf32>
    %cst_63 = arith.constant 3.100000e+01 : f32
    %190 = vector.broadcast %cst_63 : f32 to vector<16x1xf32>
    %191 = arith.divf %189, %190 : vector<16x1xf32>
    %192 = math.sqrt %191 : vector<16x1xf32>
    %cst_64 = arith.constant 9.99999997E-7 : f32
    %193 = vector.broadcast %cst_64 : f32 to vector<16x1xf32>
    %194 = arith.addf %192, %193 : vector<16x1xf32>
    %cst_65 = arith.constant 1.000000e+00 : f32
    %195 = vector.broadcast %cst_65 : f32 to vector<16x1xf32>
    %196 = arith.divf %195, %194 : vector<16x1xf32>
    %197 = vector.broadcast %196 : vector<16x1xf32> to vector<16x32xf32>
    %198 = arith.mulf %186, %197 : vector<16x32xf32>
    %199 = vector.broadcast %169 : vector<1x32xf32> to vector<16x32xf32>
    %200 = arith.mulf %199, %198 : vector<16x32xf32>
    %201 = vector.broadcast %170 : vector<1x32xf32> to vector<16x32xf32>
    %202 = arith.addf %200, %201 : vector<16x32xf32>
    %cst_66 = arith.constant dense<0.000000e+00> : vector<16x96xf32>
    %203 = tpu.matmul %202, %173, %cst_66 {dimension_numbers = #tpu.dot_dimension_numbers<[1], [0], [0], [1], [0, 0, 1, 1], [], []>} : vector<16x32xf32>, vector<32x96xf32>, vector<16x96xf32> -> vector<16x96xf32>
    %204 = vector.broadcast %174 : vector<1x96xf32> to vector<16x96xf32>
    %205 = arith.addf %203, %204 : vector<16x96xf32>
    %206 = vector.extract_strided_slice %205 {offsets = [0, 0], sizes = [16, 8], strides = [1, 1]} : vector<16x96xf32> to vector<16x8xf32>
    %207 = vector.extract_strided_slice %205 {offsets = [0, 8], sizes = [16, 8], strides = [1, 1]} : vector<16x96xf32> to vector<16x8xf32>
    %208 = vector.extract_strided_slice %205 {offsets = [0, 16], sizes = [16, 8], strides = [1, 1]} : vector<16x96xf32> to vector<16x8xf32>
    %209 = vector.extract_strided_slice %205 {offsets = [0, 24], sizes = [16, 8], strides = [1, 1]} : vector<16x96xf32> to vector<16x8xf32>
    %210 = vector.shape_cast %206 : vector<16x8xf32> to vector<1x16x8xf32>
    %211 = vector.shape_cast %207 : vector<16x8xf32> to vector<1x16x8xf32>
    %212 = vector.shape_cast %208 : vector<16x8xf32> to vector<1x16x8xf32>
    %213 = vector.shape_cast %209 : vector<16x8xf32> to vector<1x16x8xf32>
    %214 = tpu.concatenate %210, %211, %212, %213 in 0 : vector<1x16x8xf32>, vector<1x16x8xf32>, vector<1x16x8xf32>, vector<1x16x8xf32> -> vector<4x16x8xf32>
    %215 = vector.extract_strided_slice %205 {offsets = [0, 32], sizes = [16, 8], strides = [1, 1]} : vector<16x96xf32> to vector<16x8xf32>
    %216 = vector.extract_strided_slice %205 {offsets = [0, 40], sizes = [16, 8], strides = [1, 1]} : vector<16x96xf32> to vector<16x8xf32>
    %217 = vector.extract_strided_slice %205 {offsets = [0, 48], sizes = [16, 8], strides = [1, 1]} : vector<16x96xf32> to vector<16x8xf32>
    %218 = vector.extract_strided_slice %205 {offsets = [0, 56], sizes = [16, 8], strides = [1, 1]} : vector<16x96xf32> to vector<16x8xf32>
    %219 = vector.shape_cast %215 : vector<16x8xf32> to vector<1x16x8xf32>
    %220 = vector.shape_cast %216 : vector<16x8xf32> to vector<1x16x8xf32>
    %221 = vector.shape_cast %217 : vector<16x8xf32> to vector<1x16x8xf32>
    %222 = vector.shape_cast %218 : vector<16x8xf32> to vector<1x16x8xf32>
    %223 = tpu.concatenate %219, %220, %221, %222 in 0 : vector<1x16x8xf32>, vector<1x16x8xf32>, vector<1x16x8xf32>, vector<1x16x8xf32> -> vector<4x16x8xf32>
    %224 = vector.extract_strided_slice %205 {offsets = [0, 64], sizes = [16, 8], strides = [1, 1]} : vector<16x96xf32> to vector<16x8xf32>
    %225 = vector.extract_strided_slice %205 {offsets = [0, 72], sizes = [16, 8], strides = [1, 1]} : vector<16x96xf32> to vector<16x8xf32>
    %226 = vector.extract_strided_slice %205 {offsets = [0, 80], sizes = [16, 8], strides = [1, 1]} : vector<16x96xf32> to vector<16x8xf32>
    %227 = vector.extract_strided_slice %205 {offsets = [0, 88], sizes = [16, 8], strides = [1, 1]} : vector<16x96xf32> to vector<16x8xf32>
    %228 = vector.shape_cast %224 : vector<16x8xf32> to vector<1x16x8xf32>
    %229 = vector.shape_cast %225 : vector<16x8xf32> to vector<1x16x8xf32>
    %230 = vector.shape_cast %226 : vector<16x8xf32> to vector<1x16x8xf32>
    %231 = vector.shape_cast %227 : vector<16x8xf32> to vector<1x16x8xf32>
    %232 = tpu.concatenate %228, %229, %230, %231 in 0 : vector<1x16x8xf32>, vector<1x16x8xf32>, vector<1x16x8xf32>, vector<1x16x8xf32> -> vector<4x16x8xf32>
    "tpu.trace_start"() <{level = 10 : i32, message = "hqd,hkd->hqk"}> : () -> ()
    %cst_67 = arith.constant dense<0.000000e+00> : vector<4x16x16xf32>
    %233 = tpu.matmul %214, %223, %cst_67 {dimension_numbers = #tpu.dot_dimension_numbers<[2], [2], [1], [1], [0, 0, 0, 1, 1, 1], [0], [0]>} : vector<4x16x8xf32>, vector<4x16x8xf32>, vector<4x16x16xf32> -> vector<4x16x16xf32>
    "tpu.trace_stop"() : () -> ()
    %cst_68 = arith.constant 0.353553385 : f32
    %234 = vector.broadcast %cst_68 : f32 to vector<4x16x16xf32>
    %235 = arith.mulf %233, %234 : vector<4x16x16xf32>
    %cst_69 = arith.constant -1.000000e+09 : f32
    %236 = vector.shape_cast %41 : vector<16x16xi1> to vector<1x16x16xi1>
    %237 = vector.broadcast %236 : vector<1x16x16xi1> to vector<4x16x16xi1>
    %238 = vector.broadcast %cst_69 : f32 to vector<4x16x16xf32>
    %239 = arith.select %237, %235, %238 : vector<4x16x16xi1>, vector<4x16x16xf32>
    %cst_70 = arith.constant dense<0xFF800000> : vector<4x16xf32>
    %240 = vector.multi_reduction <maximumf>, %239, %cst_70 [2] : vector<4x16x16xf32> to vector<4x16xf32>
    %241 = vector.shape_cast %240 : vector<4x16xf32> to vector<4x16x1xf32>
    %242 = vector.broadcast %241 : vector<4x16x1xf32> to vector<4x16x16xf32>
    %243 = arith.subf %239, %242 : vector<4x16x16xf32>
    %244 = math.exp %243 : vector<4x16x16xf32>
    %cst_71 = arith.constant dense<0.000000e+00> : vector<4x16xf32>
    %245 = vector.multi_reduction <add>, %244, %cst_71 [2] : vector<4x16x16xf32> to vector<4x16xf32>
    %246 = vector.shape_cast %245 : vector<4x16xf32> to vector<4x16x1xf32>
    %cst_72 = arith.constant 1.000000e+00 : f32
    %247 = vector.broadcast %cst_72 : f32 to vector<4x16x1xf32>
    %248 = arith.divf %247, %246 : vector<4x16x1xf32>
    %249 = vector.broadcast %248 : vector<4x16x1xf32> to vector<4x16x16xf32>
    %250 = arith.mulf %244, %249 : vector<4x16x16xf32>
    "tpu.trace_start"() <{level = 10 : i32, message = "hqk,hkd->hqd"}> : () -> ()
    %cst_73 = arith.constant dense<0.000000e+00> : vector<4x16x8xf32>
    %251 = tpu.matmul %250, %232, %cst_73 {dimension_numbers = #tpu.dot_dimension_numbers<[2], [1], [1], [2], [0, 0, 0, 1, 1, 2], [0], [0]>} : vector<4x16x16xf32>, vector<4x16x8xf32>, vector<4x16x8xf32> -> vector<4x16x8xf32>
    "tpu.trace_stop"() : () -> ()
    %252 = vector.extract_strided_slice %251 {offsets = [0, 0, 0], sizes = [1, 16, 8], strides = [1, 1, 1]} : vector<4x16x8xf32> to vector<1x16x8xf32>
    %253 = vector.shape_cast %252 : vector<1x16x8xf32> to vector<16x8xf32>
    %254 = vector.extract_strided_slice %251 {offsets = [1, 0, 0], sizes = [1, 16, 8], strides = [1, 1, 1]} : vector<4x16x8xf32> to vector<1x16x8xf32>
    %255 = vector.shape_cast %254 : vector<1x16x8xf32> to vector<16x8xf32>
    %256 = vector.extract_strided_slice %251 {offsets = [2, 0, 0], sizes = [1, 16, 8], strides = [1, 1, 1]} : vector<4x16x8xf32> to vector<1x16x8xf32>
    %257 = vector.shape_cast %256 : vector<1x16x8xf32> to vector<16x8xf32>
    %258 = vector.extract_strided_slice %251 {offsets = [3, 0, 0], sizes = [1, 16, 8], strides = [1, 1, 1]} : vector<4x16x8xf32> to vector<1x16x8xf32>
    %259 = vector.shape_cast %258 : vector<1x16x8xf32> to vector<16x8xf32>
    %260 = tpu.concatenate %253, %255, %257, %259 in 1 : vector<16x8xf32>, vector<16x8xf32>, vector<16x8xf32>, vector<16x8xf32> -> vector<16x32xf32>
    %cst_74 = arith.constant dense<0.000000e+00> : vector<16x32xf32>
    %261 = tpu.matmul %260, %175, %cst_74 {dimension_numbers = #tpu.dot_dimension_numbers<[1], [0], [0], [1], [0, 0, 1, 1], [], []>} : vector<16x32xf32>, vector<32x32xf32>, vector<16x32xf32> -> vector<16x32xf32>
    %262 = arith.addf %168, %261 : vector<16x32xf32>
    %263 = vector.broadcast %176 : vector<1x32xf32> to vector<16x32xf32>
    %264 = arith.addf %262, %263 : vector<16x32xf32>
    %cst_75 = arith.constant dense<0.000000e+00> : vector<16xf32>
    %265 = vector.multi_reduction <add>, %264, %cst_75 [1] : vector<16x32xf32> to vector<16xf32>
    %266 = vector.shape_cast %265 : vector<16xf32> to vector<16x1xf32>
    %cst_76 = arith.constant 3.200000e+01 : f32
    %267 = vector.broadcast %cst_76 : f32 to vector<16x1xf32>
    %268 = arith.divf %266, %267 : vector<16x1xf32>
    %269 = vector.broadcast %268 : vector<16x1xf32> to vector<16x32xf32>
    %270 = arith.subf %264, %269 : vector<16x32xf32>
    %271 = arith.mulf %270, %270 : vector<16x32xf32>
    %cst_77 = arith.constant dense<0.000000e+00> : vector<16xf32>
    %272 = vector.multi_reduction <add>, %271, %cst_77 [1] : vector<16x32xf32> to vector<16xf32>
    %273 = vector.shape_cast %272 : vector<16xf32> to vector<16x1xf32>
    %cst_78 = arith.constant 3.100000e+01 : f32
    %274 = vector.broadcast %cst_78 : f32 to vector<16x1xf32>
    %275 = arith.divf %273, %274 : vector<16x1xf32>
    %276 = math.sqrt %275 : vector<16x1xf32>
    %cst_79 = arith.constant 9.99999997E-7 : f32
    %277 = vector.broadcast %cst_79 : f32 to vector<16x1xf32>
    %278 = arith.addf %276, %277 : vector<16x1xf32>
    %cst_80 = arith.constant 1.000000e+00 : f32
    %279 = vector.broadcast %cst_80 : f32 to vector<16x1xf32>
    %280 = arith.divf %279, %278 : vector<16x1xf32>
    %281 = vector.broadcast %280 : vector<16x1xf32> to vector<16x32xf32>
    %282 = arith.mulf %270, %281 : vector<16x32xf32>
    %283 = vector.broadcast %171 : vector<1x32xf32> to vector<16x32xf32>
    %284 = arith.mulf %283, %282 : vector<16x32xf32>
    %285 = vector.broadcast %172 : vector<1x32xf32> to vector<16x32xf32>
    %286 = arith.addf %284, %285 : vector<16x32xf32>
    %cst_81 = arith.constant dense<0.000000e+00> : vector<16x64xf32>
    %287 = tpu.matmul %286, %177, %cst_81 {dimension_numbers = #tpu.dot_dimension_numbers<[1], [0], [0], [1], [0, 0, 1, 1], [], []>} : vector<16x32xf32>, vector<32x64xf32>, vector<16x64xf32> -> vector<16x64xf32>
    %288 = vector.broadcast %178 : vector<1x64xf32> to vector<16x64xf32>
    %289 = arith.addf %287, %288 : vector<16x64xf32>
    %cst_82 = arith.constant 0.000000e+00 : f32
    %290 = vector.broadcast %cst_82 : f32 to vector<16x64xf32>
    %291 = arith.maximumf %289, %290 : vector<16x64xf32>
    %cst_83 = arith.constant dense<0.000000e+00> : vector<16x32xf32>
    %292 = tpu.matmul %291, %179, %cst_83 {dimension_numbers = #tpu.dot_dimension_numbers<[1], [0], [0], [1], [0, 0, 1, 1], [], []>} : vector<16x64xf32>, vector<64x32xf32>, vector<16x32xf32> -> vector<16x32xf32>
    %293 = arith.addf %264, %292 : vector<16x32xf32>
    %294 = vector.broadcast %180 : vector<1x32xf32> to vector<16x32xf32>
    %295 = arith.addf %293, %294 : vector<16x32xf32>
    %c400 = arith.constant 400 : index
    %c0_84 = arith.constant 0 : index
    %296 = vector.load %arg2[%c400, %c0_84] : memref<488x128xf32, #tpu.memory_space<vmem>>, vector<1x32xf32>
    %c401 = arith.constant 401 : index
    %c0_85 = arith.constant 0 : index
    %297 = vector.load %arg2[%c401, %c0_85] : memref<488x128xf32, #tpu.memory_space<vmem>>, vector<1x32xf32>
    %c402 = arith.constant 402 : index
    %c0_86 = arith.constant 0 : index
    %298 = vector.load %arg2[%c402, %c0_86] : memref<488x128xf32, #tpu.memory_space<vmem>>, vector<1x32xf32>
    %c403 = arith.constant 403 : index
    %c0_87 = arith.constant 0 : index
    %299 = vector.load %arg2[%c403, %c0_87] : memref<488x128xf32, #tpu.memory_space<vmem>>, vector<1x1xf32>
    %cst_88 = arith.constant dense<0.000000e+00> : vector<16xf32>
    %300 = vector.multi_reduction <add>, %295, %cst_88 [1] : vector<16x32xf32> to vector<16xf32>
    %301 = vector.shape_cast %300 : vector<16xf32> to vector<16x1xf32>
    %cst_89 = arith.constant 3.200000e+01 : f32
    %302 = vector.broadcast %cst_89 : f32 to vector<16x1xf32>
    %303 = arith.divf %301, %302 : vector<16x1xf32>
    %304 = vector.broadcast %303 : vector<16x1xf32> to vector<16x32xf32>
    %305 = arith.subf %295, %304 : vector<16x32xf32>
    %306 = arith.mulf %305, %305 : vector<16x32xf32>
    %cst_90 = arith.constant dense<0.000000e+00> : vector<16xf32>
    %307 = vector.multi_reduction <add>, %306, %cst_90 [1] : vector<16x32xf32> to vector<16xf32>
    %308 = vector.shape_cast %307 : vector<16xf32> to vector<16x1xf32>
    %cst_91 = arith.constant 3.100000e+01 : f32
    %309 = vector.broadcast %cst_91 : f32 to vector<16x1xf32>
    %310 = arith.divf %308, %309 : vector<16x1xf32>
    %311 = math.sqrt %310 : vector<16x1xf32>
    %cst_92 = arith.constant 9.99999997E-7 : f32
    %312 = vector.broadcast %cst_92 : f32 to vector<16x1xf32>
    %313 = arith.addf %311, %312 : vector<16x1xf32>
    %cst_93 = arith.constant 1.000000e+00 : f32
    %314 = vector.broadcast %cst_93 : f32 to vector<16x1xf32>
    %315 = arith.divf %314, %313 : vector<16x1xf32>
    %316 = vector.broadcast %315 : vector<16x1xf32> to vector<16x32xf32>
    %317 = arith.mulf %305, %316 : vector<16x32xf32>
    %318 = vector.broadcast %296 : vector<1x32xf32> to vector<16x32xf32>
    %319 = arith.mulf %318, %317 : vector<16x32xf32>
    %320 = vector.broadcast %297 : vector<1x32xf32> to vector<16x32xf32>
    %321 = arith.addf %319, %320 : vector<16x32xf32>
    %cst_94 = arith.constant dense<0.000000e+00> : vector<32xf32>
    %322 = vector.multi_reduction <add>, %321, %cst_94 [0] : vector<16x32xf32> to vector<32xf32>
    %323 = vector.shape_cast %322 : vector<32xf32> to vector<1x32xf32>
    %cst_95 = arith.constant 1.600000e+01 : f32
    %324 = vector.broadcast %cst_95 : f32 to vector<1x32xf32>
    %325 = arith.divf %323, %324 : vector<1x32xf32>
    %326 = arith.mulf %325, %298 : vector<1x32xf32>
    %cst_96 = arith.constant dense<0.000000e+00> : vector<1xf32>
    %327 = vector.multi_reduction <add>, %326, %cst_96 [1] : vector<1x32xf32> to vector<1xf32>
    %328 = vector.shape_cast %327 : vector<1xf32> to vector<1x1xf32>
    %329 = arith.addf %328, %299 : vector<1x1xf32>
    %330 = arith.negf %329 : vector<1x1xf32>
    %331 = math.exp %330 : vector<1x1xf32>
    %cst_97 = arith.constant 1.000000e+00 : f32
    %332 = vector.broadcast %cst_97 : f32 to vector<1x1xf32>
    %333 = arith.addf %332, %331 : vector<1x1xf32>
    %334 = arith.divf %332, %333 : vector<1x1xf32>
    %c0_98 = arith.constant 0 : index
    %c0_99 = arith.constant 0 : index
    %335 = vector.load %arg3[%c0_98, %c0_99] : memref<1x1xf32, #tpu.memory_space<vmem>>, vector<1x1xf32>
    tpu.vector_store %arg3[%c0_98, %c0_99], %334 {strides = array<i32>} : memref<1x1xf32, #tpu.memory_space<vmem>>, vector<1x1xf32>,
    return
  }
}

</mosaic_0001>

<bundles_post_ra>
// kernel: squeeze.2
= control target key start
LH: loop header
LB: loop body
LE: loop exit
PB: predicated region body
PF: predicated region fallthrough
CT: control target
= control target key end

     0   :  { %vm7_vm0 = vcmask 64512   ;;  %vm13_vm1 = vcmask 130112   ;;  %s39_s0 = inlined_call_operand.vmem [shape: f32[2,8], index: 0, kind: input, shape index: {}]   ;;  %s40_s1 = inlined_call_operand.vmem [shape: f32[1,16], index: 1, kind: output, shape index: {}]  }
   0x1   :  { %v4_v0 = vld [vmem:[%s39_s0] sm:$0x3]  ;;  %s22_s0 = smov 8  }
   0x2   :  { %5 = vst [vmem:[#allocation1] sm:$0x3] %v4_v0 }
   0x9   :  { %v10_v1 = vld [vmem:[#allocation1 + $0x1] sm:$0x1]   ;;  %v6_v2 = vld [vmem:[#allocation1] sm:$0x1]  }
   0xa   :  { %11 = vrot.lane.b32.xlu0 %v10_v1, %s22_s0  ;;  %8 = vst.msk [vmem:[#allocation0] sm:$0x1] %vm7_vm0, %v6_v2  }
  0x7c   :  { %v12_v3 = vpop.permute.xlu0 %11  }
  0x7d   :  { %14 = vst.msk [vmem:[#allocation0] sm:$0x1] %vm13_vm1, %v12_v3  }
  0x84   :  { %v18_v4 = vld [vmem:[#allocation0] sm:$0x1] }
  0x85   :  { %20 = vst [vmem:[%s40_s1] sm:$0x1] %v18_v4 }

// kernel: transformer_forward.1
= control target key start
LH: loop header
LB: loop body
LE: loop exit
PB: predicated region body
PF: predicated region fallthrough
CT: control target
= control target key end

     0   :  { %8 = vsyncpa [#allocation3], 0  ;;  %s4370_s0 = inlined_call_operand.vmem [shape: s32[16,1], index: 0, kind: input, shape index: {}]   ;;  %s4371_s1 = inlined_call_operand.vmem [shape: f32[1,16], index: 1, kind: input, shape index: {}]   ;;  %s4372_s2 = inlined_call_operand.hbm [shape: f32[488,128], index: 2, kind: input, shape index: {}]   ;;  %s4373_s3 = inlined_call_operand.hbm [shape: f32[1,1], index: 3, kind: output, shape index: {}]  }
   0x1   :  { %9 = vsyncpa [#allocation4], 0  ;;  %s3935_s12 = smov [#allocation2]   ;;  %s3887_s16 = scalar_lea.hbm %s4372_s2, 7808 }
   0x2   :  { %s19_s13 = sshll.u32 %s3935_s12, 4  ;;  %p3888_p0 = scmp.ne.s32.totalorder %s4372_s2, %s3887_s16  ;;  %s20_s13 = int_to_ptr.vmem [resolvable:$true] %s19_s13 }
   0x3   :  { %p3891_p1 = scmp.lt.u32.totalorder %s3887_s16, %s4372_s2 }
   0x5   :  { %p3893_p2 = pnand %p3891_p1, %p3888_p0 }
   0x7   :  { %3896 = shalt.err (!%p3893_p2)
}
   0x8   :  { %s3897_s21 = scalar_lea.vmem %s20_s13, 7808  ;;  %p3902_p4 = scmp.lt.s32.totalorder %s20_s13, %s20_s13 }
   0x9   :  { %p3898_p3 = scmp.ne.s32.totalorder %s20_s13, %s3897_s21  ;;  %p3903_p5 = scmp.lt.s32.totalorder %s3897_s21, %s3897_s21 }
   0xb   :  { %p3904_p6 = por %p3903_p5, %p3902_p4 }
   0xd   :  { %p3905_p7 = pnand %p3904_p6, %p3898_p3 }
   0xf   :  { %3908 = shalt.err (!%p3905_p7)
}
  0x10   :  { %s3936_s22 = smov 128   ;;  %s3937_s23 = smov 8  }
  0x11   :  { %25 = dma.hbm_to_vmem [thread:$0]  %s4372_s2, 7808, %s20_s13, [#allocation3], %s3936_s22, %s3936_s22, %s3937_s23  }
  0x12   :  { %3931 = dma.done.wait [#allocation3], 7808  }
  0x13   :  { %3932 = vsyncadd [#allocation3], 4294959488  ;;  %v3938_v0 = vmov 0   ;;  %v29_v1 = vld [vmem:[%s4370_s0] sm:$0xff]  ;;  %v45_v2 = vld [vmem:[#allocation2 + $0x198] sm:$0xff]  ;;  %v31_v15 = vlaneseq  ;;  %vm55_vm0 = vcmask 523264  }
  0x14   :  { %3698 = vset.pattern.permute.xlu0 %v3938_v0  ;;  %v46_v3 = vld [vmem:[#allocation2 + $0x1a0] sm:$0xff]  ;;  %v47_v4 = vld [vmem:[#allocation2 + $0x1a8] sm:$0xff]  ;;  %v48_v5 = vld [vmem:[#allocation2 + $0x1b0] sm:$0xff]  ;;  %v3939_v18 = vmov 0.0   ;;  %vm286_vm3 = vcmask 261120   ;;  %vm177_vm9 = vcmask 1041408  }
  0x15   :  { %34 = vperm.xlu0 %3698, %v29_v1   ;;  %v30_v6 = vld [vmem:[%s4370_s0 + $0x8] sm:$0xff]  ;;  %v3509_v7 = vpack.c.bf16 %v46_v3, %v45_v2  ;;  %v3513_v8 = vpack.c.bf16 %v48_v5, %v47_v4  ;;  %v49_v9 = vld [vmem:[#allocation2 + $0x1b8] sm:$0xff]  ;;  %v50_v10 = vld [vmem:[#allocation2 + $0x1c0] sm:$0xff]  ;;  %v32_v16 = vand.u32 127, %v31_v15  ;;  %v142_v40 = vshrl.u32 %v31_v15, 7  ;;  %s3941_s30 = smov 104  }
  0x16   :  { %v3517_v11 = vpack.c.bf16 %v50_v10, %v49_v9  ;;  %v51_v12 = vld [vmem:[#allocation2 + $0x1c8] sm:$0xff]  ;;  %v52_v13 = vld [vmem:[#allocation2 + $0x1d0] sm:$0xff]  ;;  %v53_v22 = vld [vmem:[#allocation2 + $0x1d8] sm:$0xff]  ;;  %vm170_vm10 = vcmask 15360   ;;  %s3942_s4 = smov 112   ;;  %s3943_s5 = smov 96  }
  0x17   :  { %3510 = vmatprep.subr.bf16.mxu0 %v3509_v7  ;;  %v3521_v14 = vpack.c.bf16 %v52_v13, %v51_v12  ;;  %v54_v24 = vld [vmem:[#allocation2 + $0x1e0] sm:$0xff]  ;;  %v156_v41 = vmul.u32 8, %v142_v40  ;;  %v166_v44 = vsub.s32 0, %v142_v40  ;;  %v144_v45 = vmul.u32 8, %v32_v16  ;;  %v262_v48 = vld [vmem:[#allocation2 + $0x8] sm:$0xff]  ;;  %v263_v49 = vld [vmem:[#allocation2 + $0x10] sm:$0xff] }
  0x18   :  { %3512 = vmatpush3.bf16.msra.mxu0 %v3509_v7  ;;  %v137_v42 = vld [vmem:[%s4371_s1] sm:$0x1]  ;;  %v143_v46 = vadd.s32 8, %v142_v40  ;;  %v264_v53 = vld [vmem:[#allocation2 + $0x18] sm:$0xff]  ;;  %v3525_v56 = vpack.c.bf16 %v263_v49, %v262_v48  ;;  %v3054_v15 = vld [vmem:[#allocation2 + $0x1] ss:$0 sm:$0xff] }
  0x19   :  { %37 = vperm.xlu0 %3698, %v30_v6   ;;  %3514 = vmatprep.subr.bf16.mxu0 %v3513_v8  ;;  %vm157_vm4 = vcmp.ge.s32.totalorder %v32_v16, %v156_v41  ;;  %v158_v43 = vadd.s32 8, %v156_v41  ;;  %vm138_vm5 = vcmp.ne.f32.partialorder %v137_v42, 0.0  ;;  %vm145_vm8 = vcmp.ge.s32.totalorder %v142_v40, %v144_v45  ;;  %v265_v54 = vld [vmem:[#allocation2 + $0x20] sm:$0xff]  ;;  %s3940_s1 = smov 120   ;;  %s3944_s6 = smov 64  }
  0x1a   :  { %v3046_v47 = vsel %vm138_vm5, 1.0, %v3939_v18  ;;  %v147_v51 = vadd.s32 8, %v144_v45  ;;  %vm146_vm11 = vcmp.ge.s32.totalorder %v143_v46, %v144_v45  ;;  %v3529_v58 = vpack.c.bf16 %v265_v54, %v264_v53  ;;  %v3053_v13 = vld [vmem:[#allocation2] ss:$0 sm:$0xff]  ;;  %s3945_s7 = smov 16   ;;  %s3946_s8 = smov 24  }
  0x1b   :  { %vm159_vm6 = vcmp.lt.s32.totalorder %v32_v16, %v158_v43  ;;  %v167_v50 = vrot.slane %v3046_v47, %v166_v44  ;;  %s3947_s9 = smov [#allocation5]  }
  0x1c   :  { %3516 = vmatpush3.bf16.msra.mxu0 %v3513_v8  ;;  %vm160_vm7 = vmand %vm157_vm4, %vm159_vm6  ;;  %vm148_vm12 = vcmp.lt.s32.totalorder %v142_v40, %v147_v51  ;;  %vm149_vm13 = vcmp.lt.s32.totalorder %v143_v46, %v147_v51  ;;  %vm446_vm6 = vcmask 64512   ;;  %s3033_s10 = sshll.u32 %s3947_s9, 4  ;;  %s3034_s10 = int_to_ptr.vmem [resolvable:$true] %s3033_s10 }
  0x1d   :  { %3518 = vmatprep.subr.bf16.mxu0 %v3517_v11  ;;  %v3049_v52 = vsel %vm160_vm7, 1.0, %v3939_v18  ;;  %vm150_vm14 = vmand %vm145_vm8, %vm148_vm12  ;;  %vm811_vm8 = vcmask 130048   ;;  %s3909_s11 = scalar_lea.vmem %s3034_s10, 16  ;;  %s3913_s12 = scalar_lea.vmem %s3034_s10, 32 }
  0x1e   :  { %v169_v55 = vmul.f32 %v3049_v52, %v167_v50  ;;  %v3047_v57 = vsel %vm150_vm14, 1.0, %v3939_v18  ;;  %vm151_vm15 = vmand %vm146_vm11, %vm149_vm13  ;;  %vm1284_vm11 = vcmask 195584   ;;  %p3910_p8 = scmp.ne.s32.totalorder %s3034_s10, %s3909_s11  ;;  %p3914_p9 = scmp.lt.s32.totalorder %s3034_s10, %s3034_s10 }
  0x1f   :  { %3290 = vmatprep.mubr.msk.f32.mxu1 %vm170_vm10, %v3047_v57  ;;  %v3048_v59 = vsel %vm151_vm15, 1.0, %v3939_v18  ;;  %vm4054_vm7 = vmpackc.low %vm446_vm6, %vm446_vm6  ;;  %p3915_p10 = scmp.lt.s32.totalorder %s3913_s12, %s3909_s11 }
  0x20   :  { %3520 = vmatpush3.bf16.msra.mxu0 %v3517_v11  ;;  %3288 = vmatprep.subr.msk.mxu1 %vm177_vm9, %v169_v55 }
  0x21   :  { %3522 = vmatprep.subr.bf16.mxu0 %v3521_v14  ;;  %3289 = vmatpush3.msk.msra.mxu1 %vm177_vm9, %v169_v55  ;;  %p3916_p11 = por %p3915_p10, %p3914_p9 }
  0x22   :  { %3291 = vmatmul.mubr.msk.f32.vlgmr.msra.gmra.mrb[0].mxu1 %vm170_vm10, %v3048_v59  ;;  %3526 = vmatprep.subr.bf16.mxu1 %v3525_v56 }
  0x23   :  { %3528 = vmatpush3.bf16.msra.mxu1 %v3525_v56  ;;  %p3917_p12 = pnand %p3916_p11, %p3910_p8 }
  0x24   :  { %3524 = vmatpush3.bf16.msra.mxu0 %v3521_v14  ;;  %3530 = vmatprep.subr.bf16.mxu1 %v3529_v58 }
  0x27   :  { %3532 = vmatpush3.bf16.msra.mxu1 %v3529_v58 }
  0x94   :  { %v35_v17 = vpop.permute.xlu0 %34 }
  0x95   :  { %vm39_vm1 = vcmp.eq.s32.totalorder %v35_v17, %v32_v16 }
  0x96   :  { %v3042_v19 = vsel %vm39_vm1, 1.0, %v3939_v18 }
  0x97   :  { %3285 = vmatprep.mubr.msk.f32.mxu0 %vm55_vm0, %v3042_v19 }
  0x98   :  { %v38_v20 = vpop.permute.xlu0 %37 }
  0x99   :  { %vm40_vm2 = vcmp.eq.s32.totalorder %v38_v20, %v32_v16 }
  0x9a   :  { %v3043_v21 = vsel %vm40_vm2, 1.0, %v3939_v18 }
  0x9b   :  { %3286 = vmatmul.mubr.msk.f32.vlgmr.msra.gmra.mrb[0].mxu0 %vm55_vm0, %v3043_v21 }
 0x16e   :  { %v3287_v23 = vpop.f32.mrb[0].mxu0 }
 0x16f   :  { %v128_v25 = vpop.f32.mrb[1].mxu0  ;;  %v3993_v27 = vadd.f32 %v3287_v23, %v54_v24  ;;  %v3055_v24 = vld [vmem:[#allocation2 + $0x28] ss:$0 sm:$0xff] }
 0x170   :  { %v3991_v26 = vadd.f32 %v128_v25, %v53_v22  ;;  %v4024_v22 = vpop.f32.mrb[0].mxu1 }
 0x171   :  { %v290_v29 = vsel %vm286_vm3, %v3993_v27, 0.0  ;;  %v4026_v23 = vpop.f32.mrb[1].mxu1  ;;  %vm257_vm9 = vcmp.gt.f32.partialorder %v4024_v22, 0.5 }
 0x172   :  { %v287_v28 = vsel %vm286_vm3, %v3991_v26, 0.0  ;;  %vm256_vm10 = vcmp.gt.f32.partialorder %v4026_v23, 0.5 }
 0x173   :  { %288 = vadd.xlane.f32.xlu1 %v287_v28 }
 0x177   :  { %291 = vadd.xlane.f32.xlu1 %v290_v29 }
 0x200   :  { %v289_v30 = vpop.xlane.xlu1 %288 }
 0x201   :  { %v294_v31 = vmul.f32 0.03125, %v289_v30 }
 0x203   :  { %v4000_v32 = vsub.f32 %v3991_v26, %v294_v31 }
 0x204   :  { %v292_v33 = vpop.xlane.xlu1 %291 }
 0x205   :  { %v295_v34 = vmul.f32 0.03125, %v292_v33  ;;  %v298_v35 = vmul.f32 %v4000_v32, %v4000_v32 }
 0x207   :  { %v4005_v36 = vsub.f32 %v3993_v27, %v295_v34  ;;  %v300_v37 = vsel %vm286_vm3, %v298_v35, 0.0 }
 0x208   :  { %301 = vadd.xlane.f32.xlu0 %v300_v37 }
 0x209   :  { %v299_v38 = vmul.f32 %v4005_v36, %v4005_v36 }
 0x20b   :  { %v303_v39 = vsel %vm286_vm3, %v299_v38, 0.0 }
 0x20c   :  { %304 = vadd.xlane.f32.xlu1 %v303_v39 }
 0x295   :  { %v302_v60 = vpop.xlane.xlu0 %301 }
 0x296   :  { %v307_v61 = vmul.f32 0.032258064, %v302_v60 }
 0x298   :  { %3779 = vrsqrt.f32 %v307_v61  ;;  %vm311_vm1 = vcmp.eq.f32.partialorder %v307_v61, inf  ;;  %v314_v2 = vand.u32 2147483648, %v307_v61  ;;  %vm313_vm2 = vcmp.eq.f32.partialorder %v307_v61, 0.0 }
 0x299   :  { %v305_v62 = vpop.xlane.xlu1 %304 }
 0x29a   :  { %v308_v63 = vmul.f32 0.032258064, %v305_v62 }
 0x29c   :  { %3781 = vrsqrt.f32 %v308_v63  ;;  %vm318_vm4 = vcmp.eq.f32.partialorder %v308_v63, inf  ;;  %v321_v8 = vand.u32 2147483648, %v308_v63  ;;  %vm320_vm5 = vcmp.eq.f32.partialorder %v308_v63, 0.0 }
 0x2a2   :  { %v3780_v0 = vpop.eup %3779 }
 0x2a3   :  { %v310_v1 = vmul.f32 %v3780_v0, %v307_v61 }
 0x2a5   :  { %v312_v3 = vsel %vm311_vm1, %v307_v61, %v310_v1 }
 0x2a6   :  { %v3782_v4 = vpop.eup %3781  ;;  %v315_v5 = vsel %vm313_vm2, %v314_v2, %v312_v3 }
 0x2a7   :  { %v323_v6 = vadd.f32 1e-06, %v315_v5  ;;  %v317_v7 = vmul.f32 %v3782_v4, %v308_v63 }
 0x2a9   :  { %3783 = vrcp.f32 %v323_v6  ;;  %v319_v9 = vsel %vm318_vm4, %v308_v63, %v317_v7 }
 0x2aa   :  { %v322_v10 = vsel %vm320_vm5, %v321_v8, %v319_v9 }
 0x2ab   :  { %v324_v11 = vadd.f32 1e-06, %v322_v10 }
 0x2ad   :  { %3785 = vrcp.f32 %v324_v11 }
 0x2b3   :  { %v3784_v12 = vpop.eup %3783 }
 0x2b4   :  { %v329_v14 = vmul.f32 %v3784_v12, %v4000_v32 }
 0x2b6   :  { %v335_v16 = vmul.f32 %v3053_v13, %v329_v14 }
 0x2b7   :  { %v3786_v17 = vpop.eup %3785 }
 0x2b8   :  { %v330_v18 = vmul.f32 %v3786_v17, %v4005_v36  ;;  %v341_v19 = vadd.f32 %v3054_v15, %v335_v16 }
 0x2ba   :  { %v336_v20 = vmul.f32 %v3053_v13, %v330_v18  ;;  %3301 = vmatprep.mubr.msk.f32.mxu1 %vm286_vm3, %v341_v19 }
 0x2bc   :  { %v342_v21 = vadd.f32 %v3054_v15, %v336_v20 }
 0x2be   :  { %3302 = vmatmul.mubr.msk.f32.vlgmr.msra.gmra.mrb[2].mxu1 %vm286_vm3, %v342_v21 }
 0x391   :  { %v3303_v25 = vpop.f32.mrb[2].mxu1 }
 0x392   :  { %v425_v28 = vadd.f32 %v3303_v25, %v3055_v24  ;;  %v419_v29 = vpop.f32.mrb[3].mxu1 }
 0x393   :  { %v420_v30 = vadd.f32 %v3055_v24, %v419_v29 }
 0x394   :  { %432 = vrot.lane.b32.xlu1 %v425_v28, %s3940_s1 }
 0x395   :  { %438 = vrot.lane.b32.xlu0 %v420_v30, %s3941_s30  ;;  %3308 = vmatprep.mubr.msk.f32.mxu1 %vm446_vm6, %v420_v30  ;;  %v4035_v31 = vpack.i.bf16 %v425_v28, %v420_v30 }
 0x398   :  { %430 = vrot.lane.b32.xlu1 %v420_v30, %s3940_s1 }
 0x39c   :  { %436 = vrot.lane.b32.xlu1 %v425_v28, %s3942_s4 }
 0x3a0   :  { %434 = vrot.lane.b32.xlu1 %v420_v30, %s3942_s4 }
 0x3a4   :  { %440 = vrot.lane.b32.xlu1 %v425_v28, %s3941_s30 }
 0x3a8   :  { %3700 = vrot.lane.b32.xlu1 %v4035_v31, %s3943_s5 }
 0x406   :  { %v433_v32 = vpop.permute.xlu1 %432 }
 0x407   :  { %v439_v33 = vpop.permute.xlu0 %438 }
 0x408   :  { %3329 = vmatprep.mubr.msk.f32.mxu0 %vm446_vm6, %v439_v33 }
 0x40a   :  { %v431_v34 = vpop.permute.xlu1 %430 }
 0x40b   :  { %v4040_v35 = vpack.i.bf16 %v433_v32, %v431_v34 }
 0x40d   :  { %3705 = vrot.lane.b32.xlu1 %v4040_v35, %s3943_s5 }
 0x40e   :  { %v437_v36 = vpop.permute.xlu1 %436 }
 0x412   :  { %v435_v37 = vpop.permute.xlu1 %434 }
 0x413   :  { %v4044_v38 = vpack.i.bf16 %v437_v36, %v435_v37 }
 0x415   :  { %3710 = vrot.lane.b32.xlu1 %v4044_v38, %s3943_s5 }
 0x416   :  { %v441_v39 = vpop.permute.xlu1 %440 }
 0x417   :  { %v4048_v40 = vpack.i.bf16 %v441_v39, %v439_v33 }
 0x419   :  { %3715 = vrot.lane.b32.xlu1 %v4048_v40, %s3943_s5 }
 0x41a   :  { %v3701_v41 = vpop.permute.xlu1 %3700 }
 0x41b   :  { %v3703_v42 = vunpack.i.h.bf16 %v3701_v41  ;;  %v3702_v43 = vunpack.i.l.bf16 %v3701_v41 }
 0x41d   :  { %v3533_v45 = vpack.c.bf16 %v3703_v42, %v3702_v43 }
 0x41f   :  { %3535 = vmatprep.subr.msk.bf16.mxu1 %vm4054_vm7, %v3533_v45 }
 0x420   :  { %3538 = vmatpush3.bf16.xpose.msk.msra.mxu1 %vm4054_vm7, %v3533_v45 }
 0x427   :  { %3309 = vmatmul.mubr.msk.f32.vlgmr.msra.gmra.mrb[4].mxu1 %vm446_vm6, %v425_v28 }
 0x428   :  { %3315 = vmatprep.mubr.msk.f32.mxu1 %vm446_vm6, %v431_v34 }
 0x47f   :  { %v3706_v46 = vpop.permute.xlu1 %3705 }
 0x480   :  { %v3708_v47 = vunpack.i.h.bf16 %v3706_v46  ;;  %v3707_v48 = vunpack.i.l.bf16 %v3706_v46 }
 0x482   :  { %v3539_v49 = vpack.c.bf16 %v3708_v47, %v3707_v48 }
 0x484   :  { %3541 = vmatprep.subr.msk.bf16.mxu1 %vm4054_vm7, %v3539_v49 }
 0x485   :  { %3544 = vmatpush3.bf16.xpose.msk.msra.mxu1 %vm4054_vm7, %v3539_v49 }
 0x487   :  { %v3711_v50 = vpop.permute.xlu1 %3710 }
 0x488   :  { %v3713_v51 = vunpack.i.h.bf16 %v3711_v50  ;;  %v3712_v52 = vunpack.i.l.bf16 %v3711_v50 }
 0x48a   :  { %v3545_v53 = vpack.c.bf16 %v3713_v51, %v3712_v52 }
 0x48b   :  { %v3716_v54 = vpop.permute.xlu1 %3715 }
 0x48c   :  { %v3718_v55 = vunpack.i.h.bf16 %v3716_v54  ;;  %v3717_v56 = vunpack.i.l.bf16 %v3716_v54  ;;  %3316 = vmatmul.mubr.msk.f32.vlgmr.msra.gmra.mrb[6].mxu1 %vm446_vm6, %v433_v32  ;;  %3547 = vmatprep.subr.msk.bf16.mxu1 %vm4054_vm7, %v3545_v53 }
 0x48d   :  { %3550 = vmatpush3.bf16.xpose.msk.msra.mxu1 %vm4054_vm7, %v3545_v53  ;;  %3322 = vmatprep.mubr.msk.f32.mxu1 %vm446_vm6, %v435_v37 }
 0x48e   :  { %v3551_v57 = vpack.c.bf16 %v3718_v55, %v3717_v56 }
 0x490   :  { %3553 = vmatprep.subr.msk.bf16.mxu0 %vm4054_vm7, %v3551_v57 }
 0x491   :  { %3556 = vmatpush3.bf16.xpose.msk.msra.mxu0 %vm4054_vm7, %v3551_v57 }
 0x494   :  { %3323 = vmatmul.mubr.msk.f32.vlgmr.msra.gmra.mrb[8].mxu1 %vm446_vm6, %v437_v36 }
 0x498   :  { %3330 = vmatmul.mubr.msk.f32.vlgmr.msra.gmra.mrb[2].mxu0 %vm446_vm6, %v441_v39 }
 0x4fa   :  { %v3310_v58 = vpop.f32.mrb[4].mxu1 }
 0x4fb   :  { %v792_v59 = vmul.f32 0.35355338, %v3310_v58  ;;  %v521_v60 = vpop.f32.mrb[5].mxu1 }
 0x4fc   :  { %v791_v61 = vmul.f32 0.35355338, %v521_v60 }
 0x4fd   :  { %v804_v62 = vsel %vm257_vm9, %v792_v59, -1e+09 }
 0x4fe   :  { %v815_v63 = vsel %vm811_vm8, %v804_v62, -inf  ;;  %v803_v0 = vsel %vm256_vm10, %v791_v61, -1e+09 }
 0x4ff   :  { %816 = vmax.xlane.f32.xlu1 %v815_v63  ;;  %v812_v1 = vsel %vm811_vm8, %v803_v0, -inf }
 0x500   :  { %813 = vmax.xlane.f32.xlu0 %v812_v1 }
 0x55f   :  { %v3317_v2 = vpop.f32.mrb[6].mxu1 }
 0x560   :  { %v794_v3 = vmul.f32 0.35355338, %v3317_v2  ;;  %v608_v4 = vpop.f32.mrb[7].mxu1 }
 0x561   :  { %v793_v5 = vmul.f32 0.35355338, %v608_v4 }
 0x562   :  { %v806_v6 = vsel %vm257_vm9, %v794_v3, -1e+09 }
 0x563   :  { %v821_v7 = vsel %vm811_vm8, %v806_v6, -inf  ;;  %v805_v8 = vsel %vm256_vm10, %v793_v5, -1e+09 }
 0x564   :  { %822 = vmax.xlane.f32.xlu0 %v821_v7  ;;  %v818_v10 = vsel %vm811_vm8, %v805_v8, -inf }
 0x567   :  { %v3324_v9 = vpop.f32.mrb[8].mxu1 }
 0x568   :  { %v796_v11 = vmul.f32 0.35355338, %v3324_v9  ;;  %819 = vmax.xlane.f32.xlu0 %v818_v10  ;;  %v695_v12 = vpop.f32.mrb[9].mxu1 }
 0x569   :  { %v795_v18 = vmul.f32 0.35355338, %v695_v12 }
 0x56a   :  { %v808_v13 = vsel %vm257_vm9, %v796_v11, -1e+09 }
 0x56b   :  { %v3331_v14 = vpop.f32.mrb[2].mxu0  ;;  %v827_v15 = vsel %vm811_vm8, %v808_v13, -inf  ;;  %v4105_v28 = vsel %vm256_vm10, %v795_v18, -1e+09 }
 0x56c   :  { %v798_v16 = vmul.f32 0.35355338, %v3331_v14  ;;  %v782_v17 = vpop.f32.mrb[3].mxu0  ;;  %828 = vmax.xlane.f32.xlu0 %v827_v15  ;;  %v824_v29 = vsel %vm811_vm8, %v4105_v28, -inf }
 0x56d   :  { %v797_v19 = vmul.f32 0.35355338, %v782_v17 }
 0x56e   :  { %v810_v20 = vsel %vm257_vm9, %v798_v16, -1e+09 }
 0x56f   :  { %v833_v21 = vsel %vm811_vm8, %v810_v20, -inf  ;;  %v809_v24 = vsel %vm256_vm10, %v797_v19, -1e+09 }
 0x570   :  { %834 = vmax.xlane.f32.xlu0 %v833_v21  ;;  %v830_v25 = vsel %vm811_vm8, %v809_v24, -inf }
 0x571   :  { %831 = vmax.xlane.f32.xlu1 %v830_v25 }
 0x575   :  { %825 = vmax.xlane.f32.xlu1 %v824_v29 }
 0x586   :  { %3720 = vrot.lane.b32.xlu1 %v4035_v31, %s3944_s6 }
 0x58c   :  { %v817_v30 = vpop.xlane.xlu1 %816 }
 0x58d   :  { %v837_v32 = vsub.f32 %v804_v62, %v817_v30  ;;  %v814_v34 = vpop.xlane.xlu0 %813 }
 0x58e   :  { %v836_v36 = vsub.f32 %v803_v0, %v814_v34 }
 0x58f   :  { %v846_v33 = vmul.f32 1.442695, %v837_v32 }
 0x590   :  { %v844_v37 = vmul.f32 1.442695, %v836_v36 }
 0x591   :  { %3787 = vpow2.f32 %v846_v33 }
 0x592   :  { %3789 = vpow2.f32 %v844_v37 }
 0x59b   :  { %v4111_v39 = vpop.eup %3787 }
 0x59c   :  { %v863_v41 = vsel %vm811_vm8, %v4111_v39, 0.0  ;;  %v3790_v42 = vpop.eup %3789 }
 0x59d   :  { %864 = vadd.xlane.f32.xlu0 %v863_v41  ;;  %v860_v43 = vsel %vm811_vm8, %v3790_v42, 0.0 }
 0x5aa   :  { %861 = vadd.xlane.f32.xlu1 %v860_v43 }
 0x5f1   :  { %v823_v45 = vpop.xlane.xlu0 %822 }
 0x5f2   :  { %v839_v31 = vsub.f32 %v806_v6, %v823_v45 }
 0x5f4   :  { %v850_v46 = vmul.f32 1.442695, %v839_v31 }
 0x5f5   :  { %v820_v47 = vpop.xlane.xlu0 %819 }
 0x5f6   :  { %3791 = vpow2.f32 %v850_v46  ;;  %v838_v48 = vsub.f32 %v805_v8, %v820_v47 }
 0x5f8   :  { %v848_v49 = vmul.f32 1.442695, %v838_v48 }
 0x5f9   :  { %v829_v50 = vpop.xlane.xlu0 %828 }
 0x5fa   :  { %3793 = vpow2.f32 %v848_v49  ;;  %v841_v51 = vsub.f32 %v808_v13, %v829_v50 }
 0x5fc   :  { %v854_v57 = vmul.f32 1.442695, %v841_v51 }
 0x5fd   :  { %v835_v52 = vpop.xlane.xlu0 %834 }
 0x5fe   :  { %v843_v53 = vsub.f32 %v810_v20, %v835_v52  ;;  %v832_v54 = vpop.xlane.xlu1 %831 }
 0x5ff   :  { %v842_v55 = vsub.f32 %v809_v24, %v832_v54 }
 0x600   :  { %v4116_v56 = vpop.eup %3791  ;;  %v858_v58 = vmul.f32 1.442695, %v843_v53 }
 0x601   :  { %v856_v59 = vmul.f32 1.442695, %v842_v55  ;;  %v869_v60 = vsel %vm811_vm8, %v4116_v56, 0.0 }
 0x602   :  { %3795 = vpow2.f32 %v858_v58  ;;  %870 = vadd.xlane.f32.xlu0 %v869_v60  ;;  %v826_v61 = vpop.xlane.xlu1 %825  ;;  %v268_v58 = vld [vmem:[#allocation2 + $0x38] sm:$0xff] }
 0x603   :  { %3797 = vpow2.f32 %v856_v59  ;;  %v840_v10 = vsub.f32 %v4105_v28, %v826_v61 }
 0x604   :  { %v3794_v62 = vpop.eup %3793  ;;  %3799 = vpow2.f32 %v854_v57  ;;  %v267_v57 = vld [vmem:[#allocation2 + $0x30] sm:$0xff] }
 0x605   :  { %v866_v63 = vsel %vm811_vm8, %v3794_v62, 0.0  ;;  %v852_v11 = vmul.f32 1.442695, %v840_v10  ;;  %v3573_v59 = vpack.c.bf16 %v268_v58, %v267_v57 }
 0x606   :  { %867 = vadd.xlane.f32.xlu1 %v866_v63  ;;  %v3721_v0 = vpop.permute.xlu1 %3720  ;;  %v270_v63 = vld [vmem:[#allocation2 + $0x48] sm:$0xff] }
 0x607   :  { %v3723_v1 = vunpack.i.h.bf16 %v3721_v0  ;;  %v3722_v2 = vunpack.i.l.bf16 %v3721_v0  ;;  %3801 = vpow2.f32 %v852_v11 }
 0x609   :  { %v3557_v3 = vpack.c.bf16 %v3723_v1, %v3722_v2 }
 0x60b   :  { %3558 = vmatprep.subr.bf16.mxu1 %v3557_v3 }
 0x60c   :  { %v4121_v4 = vpop.eup %3795  ;;  %3560 = vmatpush3.bf16.msra.mxu1 %v3557_v3 }
 0x60d   :  { %v3798_v5 = vpop.eup %3797  ;;  %v881_v6 = vsel %vm811_vm8, %v4121_v4, 0.0 }
 0x60e   :  { %v4125_v7 = vpop.eup %3799  ;;  %882 = vadd.xlane.f32.xlu0 %v881_v6  ;;  %v878_v8 = vsel %vm811_vm8, %v3798_v5, 0.0 }
 0x60f   :  { %879 = vadd.xlane.f32.xlu1 %v878_v8  ;;  %v875_v9 = vsel %vm811_vm8, %v4125_v7, 0.0 }
 0x611   :  { %v3802_v14 = vpop.eup %3801 }
 0x612   :  { %876 = vadd.xlane.f32.xlu0 %v875_v9  ;;  %v872_v17 = vsel %vm811_vm8, %v3802_v14, 0.0 }
 0x620   :  { %3730 = vrot.lane.b32.xlu1 %v4044_v38, %s3944_s6 }
 0x628   :  { %3725 = vrot.lane.b32.xlu0 %v4040_v35, %s3944_s6 }
 0x62a   :  { %v865_v12 = vpop.xlane.xlu0 %864 }
 0x62b   :  { %3803 = vrcp.f32 %v865_v12 }
 0x635   :  { %v3804_v15 = vpop.eup %3803 }
 0x636   :  { %v901_v19 = vmul.f32 %v3804_v15, %v4111_v39 }
 0x637   :  { %v862_v13 = vpop.xlane.xlu1 %861 }
 0x638   :  { %3805 = vrcp.f32 %v862_v13 }
 0x642   :  { %v3806_v16 = vpop.eup %3805 }
 0x643   :  { %v900_v18 = vmul.f32 %v3806_v16, %v3790_v42 }
 0x644   :  { %873 = vadd.xlane.f32.xlu1 %v872_v17  ;;  %v3084_v17 = vld [vmem:[#allocation2 + $0x50] ss:$0 sm:$0xff] }
 0x645   :  { %3336 = vmatprep.mubr.msk.f32.mxu1 %vm811_vm8, %v900_v18 }
 0x646   :  { %3337 = vmatmul.mubr.msk.f32.vlgmr.msra.gmra.mrb[10].mxu1 %vm811_vm8, %v901_v19 }
 0x655   :  { %3735 = vrot.lane.b32.xlu1 %v4048_v40, %s3944_s6 }
 0x68f   :  { %v871_v38 = vpop.xlane.xlu0 %870 }
 0x693   :  { %v868_v35 = vpop.xlane.xlu1 %867 }
 0x694   :  { %3807 = vrcp.f32 %v868_v35 }
 0x695   :  { %3809 = vrcp.f32 %v871_v38 }
 0x69b   :  { %v883_v20 = vpop.xlane.xlu0 %882 }
 0x69c   :  { %v880_v21 = vpop.xlane.xlu1 %879 }
 0x69d   :  { %3811 = vrcp.f32 %v880_v21 }
 0x69e   :  { %v3808_v24 = vpop.eup %3807  ;;  %3813 = vrcp.f32 %v883_v20 }
 0x69f   :  { %v877_v25 = vpop.xlane.xlu0 %876  ;;  %v902_v28 = vmul.f32 %v3808_v24, %v3794_v62  ;;  %v3810_v39 = vpop.eup %3809  ;;  %v269_v62 = vld [vmem:[#allocation2 + $0x40] sm:$0xff] }
 0x6a0   :  { %v3731_v29 = vpop.permute.xlu1 %3730  ;;  %v903_v42 = vmul.f32 %v3810_v39, %v4116_v56  ;;  %3815 = vrcp.f32 %v877_v25  ;;  %v3577_v0 = vpack.c.bf16 %v270_v63, %v269_v62  ;;  %v273_v39 = vld [vmem:[#allocation2 + $0x60] sm:$0xff] }
 0x6a1   :  { %v3733_v30 = vunpack.i.h.bf16 %v3731_v29  ;;  %v3732_v32 = vunpack.i.l.bf16 %v3731_v29  ;;  %3343 = vmatprep.mubr.msk.f32.mxu1 %vm811_vm8, %v902_v28 }
 0x6a3   :  { %v3565_v33 = vpack.c.bf16 %v3733_v30, %v3732_v32  ;;  %v3726_v34 = vpop.permute.xlu0 %3725 }
 0x6a4   :  { %v3728_v36 = vunpack.i.h.bf16 %v3726_v34  ;;  %v3727_v37 = vunpack.i.l.bf16 %v3726_v34 }
 0x6a5   :  { %3566 = vmatprep.subr.bf16.mxu0 %v3565_v33 }
 0x6a6   :  { %v3561_v40 = vpack.c.bf16 %v3728_v36, %v3727_v37  ;;  %3568 = vmatpush3.bf16.msra.mxu0 %v3565_v33 }
 0x6a7   :  { %v3812_v41 = vpop.eup %3811  ;;  %3574 = vmatprep.subr.bf16.mxu0 %v3573_v59 }
 0x6a8   :  { %3562 = vmatprep.subr.bf16.mxu1 %v3561_v40  ;;  %v906_v43 = vmul.f32 %v3812_v41, %v3798_v5  ;;  %v3814_v49 = vpop.eup %3813  ;;  %v274_v41 = vld [vmem:[#allocation2 + $0x68] sm:$0xff] }
 0x6a9   :  { %3564 = vmatpush3.bf16.msra.mxu1 %v3561_v40  ;;  %v907_v52 = vmul.f32 %v3814_v49, %v4121_v4  ;;  %v272_v40 = vld [vmem:[#allocation2 + $0x58] sm:$0xff] }
 0x6aa   :  { %v3816_v50 = vpop.eup %3815  ;;  %v280_v49 = vld [vmem:[#allocation2 + $0x98] sm:$0xff] }
 0x6ab   :  { %v905_v54 = vmul.f32 %v3816_v50, %v4125_v7 }
 0x6ac   :  { %3344 = vmatmul.mubr.msk.f32.vlgmr.msra.gmra.mrb[12].mxu1 %vm811_vm8, %v903_v42  ;;  %v3581_v42 = vpack.c.bf16 %v273_v39, %v272_v40 }
 0x6ad   :  { %3357 = vmatprep.mubr.msk.f32.mxu1 %vm811_vm8, %v906_v43  ;;  %v275_v43 = vld [vmem:[#allocation2 + $0x70] sm:$0xff] }
 0x6d1   :  { %v874_v45 = vpop.xlane.xlu1 %873 }
 0x6d2   :  { %3817 = vrcp.f32 %v874_v45  ;;  %v3585_v45 = vpack.c.bf16 %v275_v43, %v274_v41 }
 0x6d5   :  { %v3736_v31 = vpop.permute.xlu1 %3735 }
 0x6d6   :  { %v3738_v46 = vunpack.i.h.bf16 %v3736_v31  ;;  %v3737_v47 = vunpack.i.l.bf16 %v3736_v31  ;;  %v277_v31 = vld [vmem:[#allocation2 + $0x80] sm:$0xff] }
 0x6d8   :  { %v3569_v48 = vpack.c.bf16 %v3738_v46, %v3737_v47  ;;  %v278_v46 = vld [vmem:[#allocation2 + $0x88] sm:$0xff]  ;;  %v279_v47 = vld [vmem:[#allocation2 + $0x90] sm:$0xff] }
 0x6d9   :  { %v3593_v50 = vpack.c.bf16 %v280_v49, %v279_v47  ;;  %v1611_v49 = vld [vmem:[#allocation2 + $0xd8] sm:$0xff] }
 0x6da   :  { %3570 = vmatprep.subr.bf16.mxu1 %v3569_v48 }
 0x6db   :  { %3572 = vmatpush3.bf16.msra.mxu1 %v3569_v48  ;;  %v3589_v48 = vpack.c.bf16 %v278_v46, %v277_v31 }
 0x6dc   :  { %v3818_v51 = vpop.eup %3817  ;;  %3582 = vmatprep.subr.bf16.mxu1 %v3581_v42 }
 0x6dd   :  { %v904_v53 = vmul.f32 %v3818_v51, %v3802_v14  ;;  %v281_v51 = vld [vmem:[#allocation2 + $0xa0] sm:$0xff] }
 0x6de   :  { %3358 = vmatmul.mubr.msk.f32.vlgmr.msra.gmra.mrb[14].mxu1 %vm811_vm8, %v907_v52  ;;  %v282_v52 = vld [vmem:[#allocation2 + $0xa8] sm:$0xff] }
 0x6df   :  { %3350 = vmatprep.mubr.msk.f32.mxu0 %vm811_vm8, %v904_v53  ;;  %3584 = vmatpush3.bf16.msra.mxu1 %v3581_v42  ;;  %v3597_v53 = vpack.c.bf16 %v282_v52, %v281_v51  ;;  %v1613_v52 = vld [vmem:[#allocation2 + $0xe8] sm:$0xff] }
 0x6e0   :  { %3351 = vmatmul.mubr.msk.f32.vlgmr.msra.gmra.mrb[4].mxu0 %vm811_vm8, %v905_v54  ;;  %3586 = vmatprep.subr.bf16.mxu1 %v3585_v45 }
 0x6e1   :  { %3576 = vmatpush3.bf16.msra.mxu0 %v3573_v59 }
 0x6e2   :  { %3578 = vmatprep.subr.bf16.mxu0 %v3577_v0 }
 0x6e3   :  { %3588 = vmatpush3.bf16.msra.mxu1 %v3585_v45 }
 0x6e5   :  { %3580 = vmatpush3.bf16.msra.mxu0 %v3577_v0 }
 0x6e6   :  { %3590 = vmatprep.subr.bf16.mxu0 %v3589_v48 }
 0x719   :  { %v3338_v55 = vpop.f32.mrb[10].mxu1 }
 0x71a   :  { %v986_v56 = vpop.f32.mrb[11].mxu1 }
 0x77f   :  { %v3345_v60 = vpop.f32.mrb[12].mxu1 }
 0x780   :  { %1260 = vrot.lane.b32.xlu1 %v3345_v60, %s3937_s23  ;;  %v1073_v61 = vpop.f32.mrb[13].mxu1 }
 0x781   :  { %1258 = vrot.lane.b32.xlu0 %v1073_v61, %s3937_s23 }
 0x7b1   :  { %v3359_v1 = vpop.f32.mrb[14].mxu1 }
 0x7b2   :  { %v1247_v2 = vpop.f32.mrb[15].mxu1 }
 0x7b3   :  { %v3352_v3 = vpop.f32.mrb[4].mxu0 }
 0x7b4   :  { %v1160_v4 = vpop.f32.mrb[5].mxu0  ;;  %1268 = vrot.lane.b32.xlu1 %v3352_v3, %s3945_s7 }
 0x7b5   :  { %1266 = vrot.lane.b32.xlu0 %v1160_v4, %s3945_s7 }
 0x7b8   :  { %1276 = vrot.lane.b32.xlu1 %v3359_v1, %s3946_s8 }
 0x7b9   :  { %1274 = vrot.lane.b32.xlu0 %v1247_v2, %s3946_s8 }
 0x7f2   :  { %v1261_v5 = vpop.permute.xlu1 %1260 }
 0x7f3   :  { %v1259_v6 = vpop.permute.xlu0 %1258  ;;  %v1281_v11 = vsel %vm446_vm6, %v3338_v55, %v1261_v5 }
 0x7f4   :  { %v1280_v9 = vsel %vm446_vm6, %v986_v56, %v1259_v6 }
 0x826   :  { %v1269_v7 = vpop.permute.xlu1 %1268 }
 0x827   :  { %v1267_v8 = vpop.permute.xlu0 %1266  ;;  %v1283_v14 = vsel %vm811_vm8, %v1281_v11, %v1269_v7  ;;  %v3085_v7 = vld [vmem:[#allocation2 + $0x2] ss:$0 sm:$0xff] }
 0x828   :  { %v1282_v12 = vsel %vm811_vm8, %v1280_v9, %v1267_v8  ;;  %v3086_v9 = vld [vmem:[#allocation2 + $0x3] ss:$0 sm:$0xff] }
 0x82a   :  { %v1277_v10 = vpop.permute.xlu1 %1276 }
 0x82b   :  { %v1275_v13 = vpop.permute.xlu0 %1274  ;;  %v1286_v16 = vsel %vm1284_vm11, %v1283_v14, %v1277_v10 }
 0x82c   :  { %v1285_v15 = vsel %vm1284_vm11, %v1282_v12, %v1275_v13 }
 0x82d   :  { %3368 = vmatprep.mubr.msk.f32.mxu0 %vm286_vm3, %v1285_v15 }
 0x82e   :  { %3369 = vmatmul.mubr.msk.f32.vlgmr.msra.gmra.mrb[6].mxu0 %vm286_vm3, %v1286_v16  ;;  %v283_v16 = vld [vmem:[#allocation2 + $0xb0] sm:$0xff] }
 0x82f   :  { %3592 = vmatpush3.bf16.msra.mxu0 %v3589_v48  ;;  %v1610_v48 = vld [vmem:[#allocation2 + $0xd0] sm:$0xff] }
 0x830   :  { %3594 = vmatprep.subr.bf16.mxu0 %v3593_v50  ;;  %v3605_v51 = vpack.c.bf16 %v1611_v49, %v1610_v48 }
 0x832   :  { %3606 = vmatprep.subr.bf16.mxu1 %v3605_v51 }
 0x833   :  { %3596 = vmatpush3.bf16.msra.mxu0 %v3593_v50  ;;  %v1612_v50 = vld [vmem:[#allocation2 + $0xe0] sm:$0xff] }
 0x834   :  { %3598 = vmatprep.subr.bf16.mxu0 %v3597_v53 }
 0x837   :  { %3600 = vmatpush3.bf16.msra.mxu0 %v3597_v53  ;;  %v3609_v53 = vpack.c.bf16 %v1613_v52, %v1612_v50 }
 0x901   :  { %v3370_v18 = vpop.f32.mrb[6].mxu0 }
 0x902   :  { %v1369_v19 = vadd.f32 %v3370_v18, %v3993_v27  ;;  %v1359_v35 = vpop.f32.mrb[7].mxu0 }
 0x903   :  { %v1368_v38 = vadd.f32 %v1359_v35, %v3991_v26 }
 0x904   :  { %v4166_v20 = vadd.f32 %v3084_v17, %v1369_v19  ;;  %v3087_v19 = vld [vmem:[#allocation2 + $0x78] ss:$0 sm:$0xff] }
 0x905   :  { %v4168_v21 = vadd.f32 %v3084_v17, %v1368_v38  ;;  %v284_v17 = vld [vmem:[#allocation2 + $0xb8] sm:$0xff] }
 0x906   :  { %v1379_v24 = vsel %vm286_vm3, %v4166_v20, 0.0  ;;  %v3601_v18 = vpack.c.bf16 %v284_v17, %v283_v16  ;;  %v3095_v16 = vld [vmem:[#allocation2 + $0xf0] ss:$0 sm:$0xff] }
 0x907   :  { %1380 = vadd.xlane.f32.xlu1 %v1379_v24  ;;  %v1376_v25 = vsel %vm286_vm3, %v4168_v21, 0.0 }
 0x908   :  { %1377 = vadd.xlane.f32.xlu0 %v1376_v25  ;;  %3602 = vmatprep.subr.bf16.mxu0 %v3601_v18 }
 0x909   :  { %3604 = vmatpush3.bf16.msra.mxu0 %v3601_v18 }
 0x994   :  { %v1381_v28 = vpop.xlane.xlu1 %1380 }
 0x995   :  { %v1383_v29 = vmul.f32 0.03125, %v1381_v28  ;;  %v1378_v30 = vpop.xlane.xlu0 %1377 }
 0x996   :  { %v1382_v32 = vmul.f32 0.03125, %v1378_v30  ;;  %v3092_v30 = vld [vmem:[#allocation2 + $0xc0] ss:$0 sm:$0xff] }
 0x997   :  { %v4175_v27 = vsub.f32 %v4166_v20, %v1383_v29 }
 0x998   :  { %v1384_v26 = vsub.f32 %v4168_v21, %v1382_v32 }
 0x999   :  { %v1387_v36 = vmul.f32 %v4175_v27, %v4175_v27 }
 0x99a   :  { %v1386_v33 = vmul.f32 %v1384_v26, %v1384_v26 }
 0x99b   :  { %v1391_v37 = vsel %vm286_vm3, %v1387_v36, 0.0 }
 0x99c   :  { %v1388_v34 = vsel %vm286_vm3, %v1386_v33, 0.0 }
 0x99d   :  { %1389 = vadd.xlane.f32.xlu0 %v1388_v34 }
 0x9a1   :  { %1392 = vadd.xlane.f32.xlu0 %v1391_v37 }
 0xa2a   :  { %v1390_v54 = vpop.xlane.xlu0 %1389 }
 0xa2b   :  { %v1394_v55 = vmul.f32 0.032258064, %v1390_v54 }
 0xa2d   :  { %3819 = vrsqrt.f32 %v1394_v55  ;;  %vm1398_vm12 = vcmp.eq.f32.partialorder %v1394_v55, inf  ;;  %v1401_v60 = vand.u32 2147483648, %v1394_v55  ;;  %vm1400_vm13 = vcmp.eq.f32.partialorder %v1394_v55, 0.0 }
 0xa2e   :  { %v1393_v56 = vpop.xlane.xlu0 %1392 }
 0xa2f   :  { %v1395_v57 = vmul.f32 0.032258064, %v1393_v56 }
 0xa31   :  { %3821 = vrsqrt.f32 %v1395_v57  ;;  %vm1405_vm14 = vcmp.eq.f32.partialorder %v1395_v57, inf  ;;  %v1408_v2 = vand.u32 2147483648, %v1395_v57  ;;  %vm1407_vm15 = vcmp.eq.f32.partialorder %v1395_v57, 0.0 }
 0xa37   :  { %v3820_v58 = vpop.eup %3819 }
 0xa38   :  { %v1397_v59 = vmul.f32 %v3820_v58, %v1394_v55 }
 0xa3a   :  { %v1399_v61 = vsel %vm1398_vm12, %v1394_v55, %v1397_v59 }
 0xa3b   :  { %v3822_v62 = vpop.eup %3821  ;;  %v1402_v63 = vsel %vm1400_vm13, %v1401_v60, %v1399_v61  ;;  %vm3014_vm13 = vcmask 253952  }
 0xa3c   :  { %v1410_v0 = vadd.f32 1e-06, %v1402_v63  ;;  %v1404_v1 = vmul.f32 %v3822_v62, %v1395_v57 }
 0xa3e   :  { %3823 = vrcp.f32 %v1410_v0  ;;  %v1406_v3 = vsel %vm1405_vm14, %v1395_v57, %v1404_v1 }
 0xa3f   :  { %v1409_v4 = vsel %vm1407_vm15, %v1408_v2, %v1406_v3 }
 0xa40   :  { %v1411_v5 = vadd.f32 1e-06, %v1409_v4 }
 0xa42   :  { %3825 = vrcp.f32 %v1411_v5 }
 0xa48   :  { %v3824_v6 = vpop.eup %3823 }
 0xa49   :  { %v1416_v8 = vmul.f32 %v3824_v6, %v1384_v26 }
 0xa4b   :  { %v1422_v10 = vmul.f32 %v3085_v7, %v1416_v8 }
 0xa4c   :  { %v3826_v11 = vpop.eup %3825 }
 0xa4d   :  { %v1417_v12 = vmul.f32 %v3826_v11, %v4175_v27  ;;  %v1428_v13 = vadd.f32 %v3086_v9, %v1422_v10  ;;  %v3094_v11 = vld [vmem:[#allocation2 + $0xc9] ss:$0 sm:$0xff] }
 0xa4f   :  { %v1423_v14 = vmul.f32 %v3085_v7, %v1417_v12  ;;  %3379 = vmatprep.mubr.msk.f32.mxu1 %vm286_vm3, %v1428_v13  ;;  %v3093_v7 = vld [vmem:[#allocation2 + $0xc8] ss:$0 sm:$0xff] }
 0xa51   :  { %v1429_v15 = vadd.f32 %v3086_v9, %v1423_v14 }
 0xa53   :  { %3380 = vmatmul.mubr.msk.f32.vlgmr.msra.gmra.mrb[16].mxu1 %vm286_vm3, %v1429_v15 }
 0xa54   :  { %3608 = vmatpush3.bf16.msra.mxu1 %v3605_v51 }
 0xa55   :  { %3610 = vmatprep.subr.bf16.mxu1 %v3609_v53 }
 0xa58   :  { %3612 = vmatpush3.bf16.msra.mxu1 %v3609_v53 }
 0xb26   :  { %v3381_v35 = vpop.f32.mrb[16].mxu1 }
 0xb27   :  { %v1512_v38 = vadd.f32 %v3381_v35, %v3087_v19  ;;  %v1506_v24 = vpop.f32.mrb[17].mxu1 }
 0xb28   :  { %v1507_v25 = vadd.f32 %v3087_v19, %v1506_v24 }
 0xb29   :  { %v1516_v29 = vmax.f32 %v1512_v38, 0.0 }
 0xb2a   :  { %v1515_v28 = vmax.f32 %v1507_v25, 0.0 }
 0xb2c   :  { %3398 = vmatprep.mubr.msk.f32.mxu0 %vm55_vm0, %v1515_v28 }
 0xb2d   :  { %3399 = vmatmul.mubr.msk.f32.vlgmr.msra.gmra.mrb[8].mxu0 %vm55_vm0, %v1516_v29 }
 0xc00   :  { %v3400_v32 = vpop.f32.mrb[8].mxu0 }
 0xc01   :  { %v1599_v27 = vadd.f32 %v3400_v32, %v4166_v20  ;;  %v1589_v26 = vpop.f32.mrb[9].mxu0 }
 0xc02   :  { %v1598_v33 = vadd.f32 %v1589_v26, %v4168_v21 }
 0xc03   :  { %v4189_v34 = vadd.f32 %v3092_v30, %v1599_v27 }
 0xc04   :  { %v4191_v36 = vadd.f32 %v3092_v30, %v1598_v33 }
 0xc05   :  { %v1637_v37 = vsel %vm286_vm3, %v4189_v34, 0.0 }
 0xc06   :  { %1638 = vadd.xlane.f32.xlu0 %v1637_v37  ;;  %v1634_v40 = vsel %vm286_vm3, %v4191_v36, 0.0 }
 0xc07   :  { %1635 = vadd.xlane.f32.xlu1 %v1634_v40 }
 0xc93   :  { %v1639_v39 = vpop.xlane.xlu0 %1638 }
 0xc94   :  { %v1641_v41 = vmul.f32 0.03125, %v1639_v39  ;;  %v1636_v42 = vpop.xlane.xlu1 %1635 }
 0xc95   :  { %v1640_v43 = vmul.f32 0.03125, %v1636_v42 }
 0xc96   :  { %v1643_v20 = vsub.f32 %v4189_v34, %v1641_v41 }
 0xc97   :  { %v1642_v21 = vsub.f32 %v4191_v36, %v1640_v43 }
 0xc98   :  { %v1645_v45 = vmul.f32 %v1643_v20, %v1643_v20 }
 0xc99   :  { %v1644_v31 = vmul.f32 %v1642_v21, %v1642_v21 }
 0xc9a   :  { %v1649_v46 = vsel %vm286_vm3, %v1645_v45, 0.0 }
 0xc9b   :  { %1650 = vadd.xlane.f32.xlu0 %v1649_v46  ;;  %v1646_v47 = vsel %vm286_vm3, %v1644_v31, 0.0 }
 0xc9c   :  { %1647 = vadd.xlane.f32.xlu1 %v1646_v47 }
 0xd28   :  { %v1651_v54 = vpop.xlane.xlu0 %1650 }
 0xd29   :  { %v1653_v55 = vmul.f32 0.032258064, %v1651_v54  ;;  %v1648_v56 = vpop.xlane.xlu1 %1647 }
 0xd2a   :  { %v1652_v57 = vmul.f32 0.032258064, %v1648_v56 }
 0xd2b   :  { %3827 = vrsqrt.f32 %v1653_v55  ;;  %vm1663_vm1 = vcmp.eq.f32.partialorder %v1653_v55, inf  ;;  %v1666_v61 = vand.u32 2147483648, %v1653_v55  ;;  %vm1665_vm2 = vcmp.eq.f32.partialorder %v1653_v55, 0.0 }
 0xd2c   :  { %3829 = vrsqrt.f32 %v1652_v57  ;;  %vm1656_vm4 = vcmp.eq.f32.partialorder %v1652_v57, inf  ;;  %v1659_v0 = vand.u32 2147483648, %v1652_v57  ;;  %vm1658_vm5 = vcmp.eq.f32.partialorder %v1652_v57, 0.0 }
 0xd35   :  { %v3828_v58 = vpop.eup %3827 }
 0xd36   :  { %v3830_v59 = vpop.eup %3829  ;;  %v1662_v60 = vmul.f32 %v3828_v58, %v1653_v55 }
 0xd37   :  { %v1655_v62 = vmul.f32 %v3830_v59, %v1652_v57 }
 0xd38   :  { %v1664_v63 = vsel %vm1663_vm1, %v1653_v55, %v1662_v60 }
 0xd39   :  { %v1667_v1 = vsel %vm1665_vm2, %v1666_v61, %v1664_v63  ;;  %v1657_v2 = vsel %vm1656_vm4, %v1652_v57, %v1655_v62 }
 0xd3a   :  { %v1669_v3 = vadd.f32 1e-06, %v1667_v1  ;;  %v1660_v4 = vsel %vm1658_vm5, %v1659_v0, %v1657_v2 }
 0xd3b   :  { %v1668_v5 = vadd.f32 1e-06, %v1660_v4 }
 0xd3c   :  { %3831 = vrcp.f32 %v1669_v3 }
 0xd3d   :  { %3833 = vrcp.f32 %v1668_v5 }
 0xd46   :  { %v3832_v6 = vpop.eup %3831 }
 0xd47   :  { %v3834_v8 = vpop.eup %3833  ;;  %v1675_v9 = vmul.f32 %v3832_v6, %v1643_v20 }
 0xd48   :  { %v1674_v10 = vmul.f32 %v3834_v8, %v1642_v21 }
 0xd49   :  { %v1681_v12 = vmul.f32 %v3093_v7, %v1675_v9 }
 0xd4a   :  { %v1680_v13 = vmul.f32 %v3093_v7, %v1674_v10 }
 0xd4b   :  { %v1687_v15 = vadd.f32 %v3094_v11, %v1681_v12 }
 0xd4c   :  { %v1686_v14 = vadd.f32 %v3094_v11, %v1680_v13 }
 0xd4e   :  { %3409 = vmatprep.mubr.msk.f32.mxu1 %vm286_vm3, %v1686_v14 }
 0xd4f   :  { %3410 = vmatmul.mubr.msk.f32.vlgmr.msra.gmra.mrb[18].mxu1 %vm286_vm3, %v1687_v15 }
 0xe22   :  { %v3411_v17 = vpop.f32.mrb[18].mxu1 }
 0xe23   :  { %v1770_v18 = vadd.f32 %v3411_v17, %v3095_v16  ;;  %v1764_v19 = vpop.f32.mrb[19].mxu1 }
 0xe24   :  { %v1765_v35 = vadd.f32 %v3095_v16, %v1764_v19 }
 0xe25   :  { %1781 = vrot.lane.b32.xlu1 %v1770_v18, %s3942_s4  ;;  %1777 = vrot.lane.b32.xlu0 %v1770_v18, %s3940_s1 }
 0xe26   :  { %3416 = vmatprep.mubr.msk.f32.mxu1 %vm446_vm6, %v1765_v35  ;;  %v4208_v38 = vpack.i.bf16 %v1770_v18, %v1765_v35 }
 0xe29   :  { %1783 = vrot.lane.b32.xlu0 %v1765_v35, %s3941_s30  ;;  %1775 = vrot.lane.b32.xlu1 %v1765_v35, %s3940_s1 }
 0xe2d   :  { %3740 = vrot.lane.b32.xlu0 %v4208_v38, %s3943_s5  ;;  %1779 = vrot.lane.b32.xlu1 %v1765_v35, %s3942_s4 }
 0xe31   :  { %1785 = vrot.lane.b32.xlu1 %v1770_v18, %s3941_s30 }
 0xe97   :  { %v1782_v24 = vpop.permute.xlu1 %1781  ;;  %v1778_v25 = vpop.permute.xlu0 %1777 }
 0xe9b   :  { %v1784_v28 = vpop.permute.xlu0 %1783  ;;  %v1776_v29 = vpop.permute.xlu1 %1775 }
 0xe9c   :  { %v4214_v30 = vpack.i.bf16 %v1778_v25, %v1776_v29  ;;  %3423 = vmatprep.mubr.msk.f32.mxu0 %vm446_vm6, %v1776_v29 }
 0xe9e   :  { %3745 = vrot.lane.b32.xlu1 %v4214_v30, %s3943_s5 }
 0xe9f   :  { %v3741_v32 = vpop.permute.xlu0 %3740  ;;  %v1780_v27 = vpop.permute.xlu1 %1779 }
 0xea0   :  { %v3743_v26 = vunpack.i.h.bf16 %v3741_v32  ;;  %v3742_v33 = vunpack.i.l.bf16 %v3741_v32  ;;  %v4219_v37 = vpack.i.bf16 %v1782_v24, %v1780_v27 }
 0xea2   :  { %v3613_v40 = vpack.c.bf16 %v3743_v26, %v3742_v33  ;;  %3750 = vrot.lane.b32.xlu0 %v4219_v37, %s3943_s5 }
 0xea3   :  { %v1786_v39 = vpop.permute.xlu1 %1785 }
 0xea4   :  { %v4223_v41 = vpack.i.bf16 %v1786_v39, %v1784_v28  ;;  %3615 = vmatprep.subr.msk.bf16.mxu1 %vm4054_vm7, %v3613_v40 }
 0xea5   :  { %3618 = vmatpush3.bf16.xpose.msk.msra.mxu1 %vm4054_vm7, %v3613_v40 }
 0xea6   :  { %3755 = vrot.lane.b32.xlu1 %v4223_v41, %s3943_s5 }
 0xeac   :  { %3417 = vmatmul.mubr.msk.f32.vlgmr.msra.gmra.mrb[20].mxu1 %vm446_vm6, %v1770_v18 }
 0xead   :  { %3430 = vmatprep.mubr.msk.f32.mxu1 %vm446_vm6, %v1780_v27 }
 0xf10   :  { %v3746_v42 = vpop.permute.xlu1 %3745 }
 0xf11   :  { %v3748_v43 = vunpack.i.h.bf16 %v3746_v42  ;;  %v3747_v20 = vunpack.i.l.bf16 %v3746_v42 }
 0xf13   :  { %v3619_v21 = vpack.c.bf16 %v3748_v43, %v3747_v20 }
 0xf14   :  { %v3751_v45 = vpop.permute.xlu0 %3750 }
 0xf15   :  { %v3753_v31 = vunpack.i.h.bf16 %v3751_v45  ;;  %v3752_v46 = vunpack.i.l.bf16 %v3751_v45  ;;  %3621 = vmatprep.subr.msk.bf16.mxu0 %vm4054_vm7, %v3619_v21 }
 0xf16   :  { %3624 = vmatpush3.bf16.xpose.msk.msra.mxu0 %vm4054_vm7, %v3619_v21 }
 0xf17   :  { %v3625_v47 = vpack.c.bf16 %v3753_v31, %v3752_v46 }
 0xf18   :  { %v3756_v48 = vpop.permute.xlu1 %3755 }
 0xf19   :  { %v3758_v49 = vunpack.i.h.bf16 %v3756_v48  ;;  %v3757_v50 = vunpack.i.l.bf16 %v3756_v48  ;;  %3627 = vmatprep.subr.msk.bf16.mxu1 %vm4054_vm7, %v3625_v47 }
 0xf1a   :  { %3630 = vmatpush3.bf16.xpose.msk.msra.mxu1 %vm4054_vm7, %v3625_v47 }
 0xf1b   :  { %v3631_v51 = vpack.c.bf16 %v3758_v49, %v3757_v50 }
 0xf1d   :  { %3424 = vmatmul.mubr.msk.f32.vlgmr.msra.gmra.mrb[10].mxu0 %vm446_vm6, %v1778_v25  ;;  %3633 = vmatprep.subr.msk.bf16.mxu0 %vm4054_vm7, %v3631_v51 }
 0xf1e   :  { %3636 = vmatpush3.bf16.xpose.msk.msra.mxu0 %vm4054_vm7, %v3631_v51  ;;  %3437 = vmatprep.mubr.msk.f32.mxu0 %vm446_vm6, %v1784_v28 }
 0xf21   :  { %3431 = vmatmul.mubr.msk.f32.vlgmr.msra.gmra.mrb[22].mxu1 %vm446_vm6, %v1782_v24 }
 0xf25   :  { %3438 = vmatmul.mubr.msk.f32.vlgmr.msra.gmra.mrb[12].mxu0 %vm446_vm6, %v1786_v39 }
 0xf7f   :  { %v3418_v52 = vpop.f32.mrb[20].mxu1 }
 0xf80   :  { %v2136_v53 = vmul.f32 0.35355338, %v3418_v52  ;;  %v1865_v54 = vpop.f32.mrb[21].mxu1 }
 0xf81   :  { %v2135_v55 = vmul.f32 0.35355338, %v1865_v54 }
 0xf82   :  { %v2144_v56 = vsel %vm257_vm9, %v2136_v53, -1e+09 }
 0xf83   :  { %v2154_v57 = vsel %vm811_vm8, %v2144_v56, -inf  ;;  %v2143_v58 = vsel %vm256_vm10, %v2135_v55, -1e+09 }
 0xf84   :  { %2155 = vmax.xlane.f32.xlu1 %v2154_v57  ;;  %v2151_v44 = vsel %vm811_vm8, %v2143_v58, -inf }
 0xf85   :  { %2152 = vmax.xlane.f32.xlu0 %v2151_v44 }
 0xff0   :  { %v3425_v59 = vpop.f32.mrb[10].mxu0 }
 0xff1   :  { %v2138_v60 = vmul.f32 0.35355338, %v3425_v59  ;;  %v1952_v61 = vpop.f32.mrb[11].mxu0 }
 0xff2   :  { %v2137_v62 = vmul.f32 0.35355338, %v1952_v61 }
 0xff3   :  { %v2146_v63 = vsel %vm257_vm9, %v2138_v60, -1e+09 }
 0xff4   :  { %v3432_v0 = vpop.f32.mrb[22].mxu1  ;;  %v2160_v1 = vsel %vm811_vm8, %v2146_v63, -inf  ;;  %v2145_v4 = vsel %vm256_vm10, %v2137_v62, -1e+09 }
 0xff5   :  { %v2140_v2 = vmul.f32 0.35355338, %v3432_v0  ;;  %2161 = vmax.xlane.f32.xlu0 %v2160_v1  ;;  %v2039_v3 = vpop.f32.mrb[23].mxu1  ;;  %v2157_v7 = vsel %vm811_vm8, %v2145_v4, -inf }
 0xff6   :  { %v2139_v5 = vmul.f32 0.35355338, %v2039_v3 }
 0xff7   :  { %v2148_v12 = vsel %vm257_vm9, %v2140_v2, -1e+09 }
 0xff8   :  { %v3439_v6 = vpop.f32.mrb[12].mxu0  ;;  %v2147_v8 = vsel %vm256_vm10, %v2139_v5, -1e+09  ;;  %v2166_v14 = vsel %vm811_vm8, %v2148_v12, -inf }
 0xff9   :  { %v2142_v9 = vmul.f32 0.35355338, %v3439_v6  ;;  %v2126_v10 = vpop.f32.mrb[13].mxu0  ;;  %2158 = vmax.xlane.f32.xlu0 %v2157_v7  ;;  %v2163_v11 = vsel %vm811_vm8, %v2147_v8, -inf }
 0xffa   :  { %v2141_v13 = vmul.f32 0.35355338, %v2126_v10  ;;  %2164 = vmax.xlane.f32.xlu1 %v2163_v11 }
 0xffb   :  { %v2150_v17 = vsel %vm257_vm9, %v2142_v9, -1e+09 }
 0xffc   :  { %v4269_v15 = vsel %vm256_vm10, %v2141_v13, -1e+09  ;;  %v2172_v18 = vsel %vm811_vm8, %v2150_v17, -inf }
 0xffd   :  { %2167 = vmax.xlane.f32.xlu0 %v2166_v14  ;;  %v2169_v16 = vsel %vm811_vm8, %v4269_v15, -inf }
 0xffe   :  { %2170 = vmax.xlane.f32.xlu1 %v2169_v16 }
0x1001   :  { %2173 = vmax.xlane.f32.xlu0 %v2172_v18 }
0x100f   :  { %3760 = vrot.lane.b32.xlu1 %v4208_v38, %s3944_s6 }
0x1011   :  { %v2156_v19 = vpop.xlane.xlu1 %2155 }
0x1012   :  { %v2176_v35 = vsub.f32 %v2144_v56, %v2156_v19  ;;  %v2153_v23 = vpop.xlane.xlu0 %2152 }
0x1013   :  { %v2175_v25 = vsub.f32 %v2143_v58, %v2153_v23 }
0x1014   :  { %v2185_v24 = vmul.f32 1.442695, %v2176_v35 }
0x1015   :  { %v2183_v29 = vmul.f32 1.442695, %v2175_v25 }
0x1016   :  { %3835 = vpow2.f32 %v2185_v24 }
0x1017   :  { %3837 = vpow2.f32 %v2183_v29 }
0x1020   :  { %v4278_v28 = vpop.eup %3835 }
0x1021   :  { %v2202_v22 = vsel %vm811_vm8, %v4278_v28, 0.0  ;;  %v3838_v32 = vpop.eup %3837 }
0x1022   :  { %2203 = vadd.xlane.f32.xlu0 %v2202_v22  ;;  %v2199_v27 = vsel %vm811_vm8, %v3838_v32, 0.0 }
0x1033   :  { %2200 = vadd.xlane.f32.xlu1 %v2199_v27 }
0x1082   :  { %v2162_v26 = vpop.xlane.xlu0 %2161 }
0x1083   :  { %v2178_v38 = vsub.f32 %v2146_v63, %v2162_v26 }
0x1085   :  { %v2189_v33 = vmul.f32 1.442695, %v2178_v38 }
0x1086   :  { %v2159_v40 = vpop.xlane.xlu0 %2158 }
0x1087   :  { %3839 = vpow2.f32 %v2189_v33  ;;  %v2177_v39 = vsub.f32 %v2145_v4, %v2159_v40  ;;  %v2165_v42 = vpop.xlane.xlu1 %2164 }
0x1088   :  { %v2179_v43 = vsub.f32 %v2147_v8, %v2165_v42 }
0x1089   :  { %v2187_v20 = vmul.f32 1.442695, %v2177_v39 }
0x108a   :  { %v2191_v21 = vmul.f32 1.442695, %v2179_v43  ;;  %v2168_v45 = vpop.xlane.xlu0 %2167 }
0x108b   :  { %3841 = vpow2.f32 %v2187_v20  ;;  %v2180_v31 = vsub.f32 %v2148_v12, %v2168_v45  ;;  %v2171_v46 = vpop.xlane.xlu1 %2170 }
0x108c   :  { %3843 = vpow2.f32 %v2191_v21  ;;  %v2181_v0 = vsub.f32 %v4269_v15, %v2171_v46  ;;  %v1616_v46 = vld [vmem:[#allocation2 + $0x100] sm:$0xff] }
0x108d   :  { %v2193_v47 = vmul.f32 1.442695, %v2180_v31  ;;  %v1615_v31 = vld [vmem:[#allocation2 + $0xf8] sm:$0xff] }
0x108e   :  { %v2174_v48 = vpop.xlane.xlu0 %2173  ;;  %v2195_v2 = vmul.f32 1.442695, %v2181_v0 }
0x108f   :  { %3845 = vpow2.f32 %v2193_v47  ;;  %v2182_v49 = vsub.f32 %v2150_v17, %v2174_v48  ;;  %v3761_v50 = vpop.permute.xlu1 %3760  ;;  %v1617_v47 = vld [vmem:[#allocation2 + $0x108] sm:$0xff]  ;;  %v3653_v48 = vpack.c.bf16 %v1616_v46, %v1615_v31 }
0x1090   :  { %v3763_v51 = vunpack.i.h.bf16 %v3761_v50  ;;  %v3762_v52 = vunpack.i.l.bf16 %v3761_v50 }
0x1091   :  { %v4283_v53 = vpop.eup %3839  ;;  %v2197_v54 = vmul.f32 1.442695, %v2182_v49  ;;  %v1618_v49 = vld [vmem:[#allocation2 + $0x110] sm:$0xff] }
0x1092   :  { %v3637_v55 = vpack.c.bf16 %v3763_v51, %v3762_v52  ;;  %v2208_v56 = vsel %vm811_vm8, %v4283_v53, 0.0  ;;  %v3657_v50 = vpack.c.bf16 %v1618_v49, %v1617_v47 }
0x1093   :  { %3847 = vpow2.f32 %v2197_v54  ;;  %2209 = vadd.xlane.f32.xlu0 %v2208_v56 }
0x1094   :  { %3638 = vmatprep.subr.bf16.mxu1 %v3637_v55 }
0x1095   :  { %v3842_v57 = vpop.eup %3841  ;;  %3640 = vmatpush3.bf16.msra.mxu1 %v3637_v55 }
0x1096   :  { %v2205_v58 = vsel %vm811_vm8, %v3842_v57, 0.0  ;;  %v3844_v44 = vpop.eup %3843 }
0x1097   :  { %2206 = vadd.xlane.f32.xlu1 %v2205_v58  ;;  %v2211_v61 = vsel %vm811_vm8, %v3844_v44, 0.0 }
0x1099   :  { %v3846_v59 = vpop.eup %3845 }
0x109a   :  { %v2214_v60 = vsel %vm811_vm8, %v3846_v59, 0.0 }
0x109b   :  { %2215 = vadd.xlane.f32.xlu0 %v2214_v60  ;;  %2212 = vadd.xlane.f32.xlu1 %v2211_v61 }
0x109d   :  { %v4290_v62 = vpop.eup %3847 }
0x109e   :  { %v2220_v63 = vsel %vm811_vm8, %v4290_v62, 0.0 }
0x109f   :  { %2221 = vadd.xlane.f32.xlu0 %v2220_v63 }
0x10ac   :  { %3770 = vrot.lane.b32.xlu1 %v4219_v37, %s3944_s6 }
0x10af   :  { %v2204_v1 = vpop.xlane.xlu0 %2203 }
0x10b0   :  { %3849 = vrcp.f32 %v2204_v1 }
0x10b5   :  { %3765 = vrot.lane.b32.xlu0 %v4214_v30, %s3944_s6 }
0x10ba   :  { %v3850_v4 = vpop.eup %3849 }
0x10bb   :  { %v2240_v8 = vmul.f32 %v3850_v4, %v4278_v28  ;;  %v3124_v4 = vld [vmem:[#allocation2 + $0x118] ss:$0 sm:$0xff] }
0x10c0   :  { %v2201_v3 = vpop.xlane.xlu1 %2200 }
0x10c1   :  { %3851 = vrcp.f32 %v2201_v3 }
0x10c2   :  { %3853 = vpow2.f32 %v2195_v2 }
0x10cb   :  { %v3852_v5 = vpop.eup %3851 }
0x10cc   :  { %v3854_v6 = vpop.eup %3853  ;;  %v2239_v7 = vmul.f32 %v3852_v5, %v3838_v32 }
0x10cd   :  { %v2217_v30 = vsel %vm811_vm8, %v3854_v6, 0.0 }
0x10ce   :  { %3444 = vmatprep.mubr.msk.f32.mxu1 %vm811_vm8, %v2239_v7 }
0x10cf   :  { %3445 = vmatmul.mubr.msk.f32.vlgmr.msra.gmra.mrb[24].mxu1 %vm811_vm8, %v2240_v8 }
0x10d0   :  { %2218 = vadd.xlane.f32.xlu1 %v2217_v30 }
0x10e1   :  { %3775 = vrot.lane.b32.xlu1 %v4223_v41, %s3944_s6 }
0x1120   :  { %v2210_v37 = vpop.xlane.xlu0 %2209 }
0x1124   :  { %v2207_v9 = vpop.xlane.xlu1 %2206 }
0x1125   :  { %3855 = vrcp.f32 %v2207_v9 }
0x1126   :  { %3857 = vrcp.f32 %v2210_v37 }
0x1128   :  { %v2216_v10 = vpop.xlane.xlu0 %2215  ;;  %v2213_v11 = vpop.xlane.xlu1 %2212 }
0x1129   :  { %3859 = vrcp.f32 %v2216_v10 }
0x112a   :  { %3861 = vrcp.f32 %v2213_v11 }
0x112c   :  { %v2222_v12 = vpop.xlane.xlu0 %2221  ;;  %v3771_v13 = vpop.permute.xlu1 %3770 }
0x112d   :  { %v3773_v14 = vunpack.i.h.bf16 %v3771_v13  ;;  %v3772_v15 = vunpack.i.l.bf16 %v3771_v13  ;;  %3863 = vrcp.f32 %v2222_v12 }
0x112f   :  { %v3856_v16 = vpop.eup %3855  ;;  %v3645_v17 = vpack.c.bf16 %v3773_v14, %v3772_v15 }
0x1130   :  { %v3766_v18 = vpop.permute.xlu0 %3765  ;;  %v2241_v19 = vmul.f32 %v3856_v16, %v3842_v57  ;;  %v3858_v41 = vpop.eup %3857 }
0x1131   :  { %v3768_v35 = vunpack.i.h.bf16 %v3766_v18  ;;  %v3767_v24 = vunpack.i.l.bf16 %v3766_v18  ;;  %3646 = vmatprep.subr.bf16.mxu0 %v3645_v17  ;;  %v2242_v32 = vmul.f32 %v3858_v41, %v4283_v53 }
0x1132   :  { %3451 = vmatprep.mubr.msk.f32.mxu1 %vm811_vm8, %v2241_v19  ;;  %3648 = vmatpush3.bf16.msra.mxu0 %v3645_v17  ;;  %v1620_v19 = vld [vmem:[#allocation2 + $0x120] sm:$0xff] }
0x1133   :  { %v3860_v23 = vpop.eup %3859  ;;  %v3641_v25 = vpack.c.bf16 %v3768_v35, %v3767_v24  ;;  %3654 = vmatprep.subr.bf16.mxu0 %v3653_v48  ;;  %v1621_v35 = vld [vmem:[#allocation2 + $0x128] sm:$0xff]  ;;  %v1622_v24 = vld [vmem:[#allocation2 + $0x130] sm:$0xff] }
0x1134   :  { %v3862_v28 = vpop.eup %3861  ;;  %v2244_v29 = vmul.f32 %v3860_v23, %v3846_v59  ;;  %v3661_v41 = vpack.c.bf16 %v1621_v35, %v1620_v19  ;;  %v1623_v23 = vld [vmem:[#allocation2 + $0x138] sm:$0xff] }
0x1135   :  { %3642 = vmatprep.subr.bf16.mxu1 %v3641_v25  ;;  %v2243_v22 = vmul.f32 %v3862_v28, %v3844_v44  ;;  %v1625_v28 = vld [vmem:[#allocation2 + $0x148] sm:$0xff] }
0x1136   :  { %3644 = vmatpush3.bf16.msra.mxu1 %v3641_v25  ;;  %v3665_v25 = vpack.c.bf16 %v1623_v23, %v1622_v24 }
0x1137   :  { %3458 = vmatprep.mubr.msk.f32.mxu0 %vm811_vm8, %v2243_v22  ;;  %v3864_v39 = vpop.eup %3863  ;;  %v1627_v22 = vld [vmem:[#allocation2 + $0x158] sm:$0xff] }
0x1138   :  { %3459 = vmatmul.mubr.msk.f32.vlgmr.msra.gmra.mrb[14].mxu0 %vm811_vm8, %v2244_v29  ;;  %v2246_v20 = vmul.f32 %v3864_v39, %v4290_v62  ;;  %v1626_v29 = vld [vmem:[#allocation2 + $0x150] sm:$0xff] }
0x1139   :  { %3452 = vmatmul.mubr.msk.f32.vlgmr.msra.gmra.mrb[26].mxu1 %vm811_vm8, %v2242_v32  ;;  %3656 = vmatpush3.bf16.msra.mxu0 %v3653_v48  ;;  %v3669_v32 = vpack.c.bf16 %v1626_v29, %v1625_v28 }
0x113a   :  { %3658 = vmatprep.subr.bf16.mxu0 %v3657_v50 }
0x113d   :  { %3660 = vmatpush3.bf16.msra.mxu0 %v3657_v50 }
0x113e   :  { %3670 = vmatprep.subr.bf16.mxu0 %v3669_v32 }
0x115d   :  { %v2219_v27 = vpop.xlane.xlu1 %2218 }
0x115e   :  { %3865 = vrcp.f32 %v2219_v27  ;;  %v1628_v27 = vld [vmem:[#allocation2 + $0x160] sm:$0xff] }
0x1161   :  { %v3776_v26 = vpop.permute.xlu1 %3775 }
0x1162   :  { %v3778_v38 = vunpack.i.h.bf16 %v3776_v26  ;;  %v3777_v33 = vunpack.i.l.bf16 %v3776_v26  ;;  %v3673_v26 = vpack.c.bf16 %v1628_v27, %v1627_v22 }
0x1164   :  { %v3649_v40 = vpack.c.bf16 %v3778_v38, %v3777_v33  ;;  %v1629_v38 = vld [vmem:[#allocation2 + $0x168] sm:$0xff]  ;;  %v1630_v33 = vld [vmem:[#allocation2 + $0x170] sm:$0xff] }
0x1166   :  { %3650 = vmatprep.subr.bf16.mxu1 %v3649_v40 }
0x1167   :  { %3652 = vmatpush3.bf16.msra.mxu1 %v3649_v40  ;;  %v3677_v40 = vpack.c.bf16 %v1630_v33, %v1629_v38 }
0x1168   :  { %v3866_v42 = vpop.eup %3865  ;;  %3662 = vmatprep.subr.bf16.mxu1 %v3661_v41 }
0x1169   :  { %v2245_v43 = vmul.f32 %v3866_v42, %v3854_v6 }
0x116b   :  { %3465 = vmatprep.mubr.msk.f32.mxu1 %vm811_vm8, %v2245_v43 }
0x116c   :  { %3466 = vmatmul.mubr.msk.f32.vlgmr.msra.gmra.mrb[28].mxu1 %vm811_vm8, %v2246_v20 }
0x116d   :  { %3664 = vmatpush3.bf16.msra.mxu1 %v3661_v41 }
0x116e   :  { %3666 = vmatprep.subr.bf16.mxu1 %v3665_v25 }
0x1171   :  { %3668 = vmatpush3.bf16.msra.mxu1 %v3665_v25 }
0x11a2   :  { %v3446_v21 = vpop.f32.mrb[24].mxu1 }
0x11a3   :  { %v2325_v45 = vpop.f32.mrb[25].mxu1 }
0x120b   :  { %v3460_v51 = vpop.f32.mrb[14].mxu0 }
0x120c   :  { %v2499_v52 = vpop.f32.mrb[15].mxu0  ;;  %v3453_v53 = vpop.f32.mrb[26].mxu1 }
0x120d   :  { %2599 = vrot.lane.b32.xlu1 %v3453_v53, %s3937_s23  ;;  %v2412_v54 = vpop.f32.mrb[27].mxu1 }
0x120e   :  { %2597 = vrot.lane.b32.xlu0 %v2412_v54, %s3937_s23 }
0x1211   :  { %2607 = vrot.lane.b32.xlu1 %v3460_v51, %s3945_s7 }
0x1212   :  { %2605 = vrot.lane.b32.xlu0 %v2499_v52, %s3945_s7 }
0x123f   :  { %v3467_v55 = vpop.f32.mrb[28].mxu1 }
0x1240   :  { %2615 = vrot.lane.b32.xlu1 %v3467_v55, %s3946_s8  ;;  %v2586_v56 = vpop.f32.mrb[29].mxu1 }
0x1241   :  { %2613 = vrot.lane.b32.xlu0 %v2586_v56, %s3946_s8  ;;  %v3125_v56 = vld [vmem:[#allocation2 + $0xca] ss:$0 sm:$0xff] }
0x127f   :  { %v2600_v57 = vpop.permute.xlu1 %2599 }
0x1280   :  { %v2598_v58 = vpop.permute.xlu0 %2597  ;;  %v2620_v62 = vsel %vm446_vm6, %v3446_v21, %v2600_v57 }
0x1281   :  { %v2619_v60 = vsel %vm446_vm6, %v2325_v45, %v2598_v58  ;;  %v3126_v58 = vld [vmem:[#allocation2 + $0xcb] ss:$0 sm:$0xff] }
0x1283   :  { %v2608_v44 = vpop.permute.xlu1 %2607 }
0x1284   :  { %v2606_v59 = vpop.permute.xlu0 %2605  ;;  %v2622_v1 = vsel %vm811_vm8, %v2620_v62, %v2608_v44 }
0x1285   :  { %v2621_v63 = vsel %vm811_vm8, %v2619_v60, %v2606_v59 }
0x12b2   :  { %v2616_v61 = vpop.permute.xlu1 %2615 }
0x12b3   :  { %v2614_v0 = vpop.permute.xlu0 %2613  ;;  %v2624_v3 = vsel %vm1284_vm11, %v2622_v1, %v2616_v61  ;;  %v1632_v1 = vld [vmem:[#allocation2 + $0x180] sm:$0xff] }
0x12b4   :  { %v2623_v2 = vsel %vm1284_vm11, %v2621_v63, %v2614_v0  ;;  %v1631_v0 = vld [vmem:[#allocation2 + $0x178] sm:$0xff] }
0x12b5   :  { %3476 = vmatprep.mubr.msk.f32.mxu0 %vm286_vm3, %v2623_v2  ;;  %v3681_v2 = vpack.c.bf16 %v1632_v1, %v1631_v0  ;;  %v2946_v0 = vld [vmem:[#allocation2 + $0x192] sm:$0x1] }
0x12b6   :  { %3477 = vmatmul.mubr.msk.f32.vlgmr.msra.gmra.mrb[16].mxu0 %vm286_vm3, %v2624_v3  ;;  %v3127_v3 = vld [vmem:[#allocation2 + $0x140] ss:$0 sm:$0xff] }
0x12b7   :  { %3672 = vmatpush3.bf16.msra.mxu0 %v3669_v32 }
0x12b8   :  { %3674 = vmatprep.subr.bf16.mxu0 %v3673_v26 }
0x12bb   :  { %3676 = vmatpush3.bf16.msra.mxu0 %v3673_v26 }
0x12bc   :  { %3678 = vmatprep.subr.bf16.mxu0 %v3677_v40 }
0x12bf   :  { %3680 = vmatpush3.bf16.msra.mxu0 %v3677_v40 }
0x12c0   :  { %3682 = vmatprep.subr.bf16.mxu0 %v3681_v2 }
0x12c3   :  { %3684 = vmatpush3.bf16.msra.mxu0 %v3681_v2 }
0x1389   :  { %v3478_v5 = vpop.f32.mrb[16].mxu0 }
0x138a   :  { %v2707_v6 = vadd.f32 %v3478_v5, %v4189_v34  ;;  %v2697_v7 = vpop.f32.mrb[17].mxu0 }
0x138b   :  { %v2706_v8 = vadd.f32 %v2697_v7, %v4191_v36 }
0x138c   :  { %v4329_v30 = vadd.f32 %v3124_v4, %v2707_v6 }
0x138d   :  { %v4331_v37 = vadd.f32 %v3124_v4, %v2706_v8 }
0x138e   :  { %v2717_v9 = vsel %vm286_vm3, %v4329_v30, 0.0 }
0x138f   :  { %2718 = vadd.xlane.f32.xlu1 %v2717_v9  ;;  %v2714_v10 = vsel %vm286_vm3, %v4331_v37, 0.0 }
0x1390   :  { %2715 = vadd.xlane.f32.xlu0 %v2714_v10 }
0x141c   :  { %v2719_v11 = vpop.xlane.xlu1 %2718 }
0x141d   :  { %v2721_v12 = vmul.f32 0.03125, %v2719_v11  ;;  %v2716_v13 = vpop.xlane.xlu0 %2715  ;;  %v3132_v11 = vld [vmem:[#allocation2 + $0x188] ss:$0 sm:$0xff] }
0x141e   :  { %v2720_v14 = vmul.f32 0.03125, %v2716_v13 }
0x141f   :  { %v4338_v34 = vsub.f32 %v4329_v30, %v2721_v12 }
0x1420   :  { %v2722_v36 = vsub.f32 %v4331_v37, %v2720_v14 }
0x1421   :  { %v2725_v17 = vmul.f32 %v4338_v34, %v4338_v34 }
0x1422   :  { %v2724_v15 = vmul.f32 %v2722_v36, %v2722_v36 }
0x1423   :  { %v2729_v18 = vsel %vm286_vm3, %v2725_v17, 0.0 }
0x1424   :  { %v2726_v16 = vsel %vm286_vm3, %v2724_v15, 0.0 }
0x1425   :  { %2727 = vadd.xlane.f32.xlu0 %v2726_v16 }
0x1429   :  { %2730 = vadd.xlane.f32.xlu0 %v2729_v18 }
0x14b2   :  { %v2728_v39 = vpop.xlane.xlu0 %2727 }
0x14b3   :  { %v2732_v42 = vmul.f32 0.032258064, %v2728_v39 }
0x14b5   :  { %3867 = vrsqrt.f32 %v2732_v42  ;;  %vm2736_vm6 = vcmp.eq.f32.partialorder %v2732_v42, inf  ;;  %v2739_v31 = vand.u32 2147483648, %v2732_v42  ;;  %vm2738_vm7 = vcmp.eq.f32.partialorder %v2732_v42, 0.0 }
0x14b6   :  { %v2731_v43 = vpop.xlane.xlu0 %2730 }
0x14b7   :  { %v2733_v20 = vmul.f32 0.032258064, %v2731_v43 }
0x14b9   :  { %3869 = vrsqrt.f32 %v2733_v20  ;;  %vm2743_vm8 = vcmp.eq.f32.partialorder %v2733_v20, inf  ;;  %v2746_v51 = vand.u32 2147483648, %v2733_v20  ;;  %vm2745_vm9 = vcmp.eq.f32.partialorder %v2733_v20, 0.0 }
0x14bf   :  { %v3868_v21 = vpop.eup %3867 }
0x14c0   :  { %v2735_v45 = vmul.f32 %v3868_v21, %v2732_v42 }
0x14c2   :  { %v2737_v46 = vsel %vm2736_vm6, %v2732_v42, %v2735_v45 }
0x14c3   :  { %v3870_v47 = vpop.eup %3869  ;;  %v2740_v48 = vsel %vm2738_vm7, %v2739_v31, %v2737_v46 }
0x14c4   :  { %v2748_v49 = vadd.f32 1e-06, %v2740_v48  ;;  %v2742_v50 = vmul.f32 %v3870_v47, %v2733_v20  ;;  %v3133_v47 = vld [vmem:[#allocation2 + $0x190] ss:$0 sm:$0xff] }
0x14c6   :  { %3871 = vrcp.f32 %v2748_v49  ;;  %v2744_v52 = vsel %vm2743_vm8, %v2733_v20, %v2742_v50  ;;  %v3134_v50 = vld [vmem:[#allocation2 + $0x191] ss:$0 sm:$0xff] }
0x14c7   :  { %v2747_v53 = vsel %vm2745_vm9, %v2746_v51, %v2744_v52 }
0x14c8   :  { %v2749_v54 = vadd.f32 1e-06, %v2747_v53 }
0x14ca   :  { %3873 = vrcp.f32 %v2749_v54 }
0x14d0   :  { %v3872_v55 = vpop.eup %3871 }
0x14d1   :  { %v2754_v57 = vmul.f32 %v3872_v55, %v2722_v36 }
0x14d3   :  { %v2760_v44 = vmul.f32 %v3125_v56, %v2754_v57 }
0x14d4   :  { %v3874_v59 = vpop.eup %3873 }
0x14d5   :  { %v2755_v60 = vmul.f32 %v3874_v59, %v4338_v34  ;;  %v2766_v61 = vadd.f32 %v3126_v58, %v2760_v44 }
0x14d7   :  { %v2761_v62 = vmul.f32 %v3125_v56, %v2755_v60  ;;  %3487 = vmatprep.mubr.msk.f32.mxu1 %vm286_vm3, %v2766_v61 }
0x14d9   :  { %v2767_v63 = vadd.f32 %v3126_v58, %v2761_v62 }
0x14db   :  { %3488 = vmatmul.mubr.msk.f32.vlgmr.msra.gmra.mrb[30].mxu1 %vm286_vm3, %v2767_v63 }
0x15ae   :  { %v3489_v4 = vpop.f32.mrb[30].mxu1 }
0x15af   :  { %v2850_v5 = vadd.f32 %v3489_v4, %v3127_v3  ;;  %v2844_v6 = vpop.f32.mrb[31].mxu1  ;;  %v2947_v4 = vld [vmem:[#allocation2 + $0x193] sm:$0x1] }
0x15b0   :  { %v2845_v7 = vadd.f32 %v3127_v3, %v2844_v6 }
0x15b1   :  { %v2854_v9 = vmax.f32 %v2850_v5, 0.0 }
0x15b2   :  { %v2853_v8 = vmax.f32 %v2845_v7, 0.0 }
0x15b4   :  { %3506 = vmatprep.mubr.msk.f32.mxu0 %vm55_vm0, %v2853_v8 }
0x15b5   :  { %3507 = vmatmul.mubr.msk.f32.vlgmr.msra.gmra.mrb[18].mxu0 %vm55_vm0, %v2854_v9 }
0x1688   :  { %v3508_v10 = vpop.f32.mrb[18].mxu0 }
0x1689   :  { %v2937_v12 = vadd.f32 %v3508_v10, %v4329_v30  ;;  %v2927_v13 = vpop.f32.mrb[19].mxu0 }
0x168a   :  { %v2936_v14 = vadd.f32 %v2927_v13, %v4331_v37 }
0x168b   :  { %v2943_v34 = vadd.f32 %v3132_v11, %v2937_v12 }
0x168c   :  { %v2942_v36 = vadd.f32 %v3132_v11, %v2936_v14 }
0x168d   :  { %v2951_v15 = vsel %vm286_vm3, %v2943_v34, 0.0 }
0x168e   :  { %2952 = vadd.xlane.f32.xlu0 %v2951_v15  ;;  %v2948_v16 = vsel %vm286_vm3, %v2942_v36, 0.0 }
0x168f   :  { %2949 = vadd.xlane.f32.xlu1 %v2948_v16 }
0x171b   :  { %v2953_v17 = vpop.xlane.xlu0 %2952 }
0x171c   :  { %v2955_v18 = vmul.f32 0.03125, %v2953_v17  ;;  %v2950_v19 = vpop.xlane.xlu1 %2949 }
0x171d   :  { %v2954_v35 = vmul.f32 0.03125, %v2950_v19 }
0x171e   :  { %v2957_v24 = vsub.f32 %v2943_v34, %v2955_v18 }
0x171f   :  { %v2956_v41 = vsub.f32 %v2942_v36, %v2954_v35 }
0x1720   :  { %v2959_v23 = vmul.f32 %v2957_v24, %v2957_v24 }
0x1721   :  { %v2958_v25 = vmul.f32 %v2956_v41, %v2956_v41 }
0x1722   :  { %v2963_v30 = vsel %vm286_vm3, %v2959_v23, 0.0 }
0x1723   :  { %2964 = vadd.xlane.f32.xlu0 %v2963_v30  ;;  %v2960_v37 = vsel %vm286_vm3, %v2958_v25, 0.0 }
0x1724   :  { %2961 = vadd.xlane.f32.xlu1 %v2960_v37 }
0x17b0   :  { %v2965_v28 = vpop.xlane.xlu0 %2964 }
0x17b1   :  { %v2967_v29 = vmul.f32 0.032258064, %v2965_v28  ;;  %v2962_v22 = vpop.xlane.xlu1 %2961 }
0x17b2   :  { %v2966_v32 = vmul.f32 0.032258064, %v2962_v22 }
0x17b3   :  { %3875 = vrsqrt.f32 %v2967_v29  ;;  %vm2977_vm0 = vcmp.eq.f32.partialorder %v2967_v29, inf  ;;  %v2980_v33 = vand.u32 2147483648, %v2967_v29  ;;  %vm2979_vm10 = vcmp.eq.f32.partialorder %v2967_v29, 0.0 }
0x17b4   :  { %3877 = vrsqrt.f32 %v2966_v32  ;;  %vm2970_vm11 = vcmp.eq.f32.partialorder %v2966_v32, inf  ;;  %v2973_v42 = vand.u32 2147483648, %v2966_v32  ;;  %vm2972_vm12 = vcmp.eq.f32.partialorder %v2966_v32, 0.0 }
0x17bd   :  { %v3876_v27 = vpop.eup %3875 }
0x17be   :  { %v3878_v26 = vpop.eup %3877  ;;  %v2976_v38 = vmul.f32 %v3876_v27, %v2967_v29 }
0x17bf   :  { %v2969_v40 = vmul.f32 %v3878_v26, %v2966_v32 }
0x17c0   :  { %v2978_v39 = vsel %vm2977_vm0, %v2967_v29, %v2976_v38 }
0x17c1   :  { %v2981_v43 = vsel %vm2979_vm10, %v2980_v33, %v2978_v39  ;;  %v2971_v20 = vsel %vm2970_vm11, %v2966_v32, %v2969_v40 }
0x17c2   :  { %v2983_v21 = vadd.f32 1e-06, %v2981_v43  ;;  %v2974_v45 = vsel %vm2972_vm12, %v2973_v42, %v2971_v20 }
0x17c3   :  { %v2982_v31 = vadd.f32 1e-06, %v2974_v45 }
0x17c4   :  { %3879 = vrcp.f32 %v2983_v21 }
0x17c5   :  { %3881 = vrcp.f32 %v2982_v31 }
0x17ce   :  { %v3880_v46 = vpop.eup %3879 }
0x17cf   :  { %v3882_v48 = vpop.eup %3881  ;;  %v2989_v49 = vmul.f32 %v3880_v46, %v2957_v24 }
0x17d0   :  { %v2988_v51 = vmul.f32 %v3882_v48, %v2956_v41 }
0x17d1   :  { %v2995_v52 = vmul.f32 %v3133_v47, %v2989_v49 }
0x17d2   :  { %v2994_v53 = vmul.f32 %v3133_v47, %v2988_v51 }
0x17d3   :  { %v3001_v54 = vadd.f32 %v3134_v50, %v2995_v52 }
0x17d4   :  { %v3000_v55 = vadd.f32 %v3134_v50, %v2994_v53 }
0x17d5   :  { %v3003_v56 = vsel %vm286_vm3, %v3001_v54, 0.0 }
0x17d6   :  { %v3002_v57 = vsel %vm286_vm3, %v3000_v55, 0.0  ;;  %vm3025_vm3 = vcmask 0  }
0x17d7   :  { %v3004_v58 = vadd.f32 %v3003_v56, %v3002_v57 }
0x17d9   :  { %v3005_v44 = vrot.slane %v3004_v58, 4 }
0x17db   :  { %v3006_v59 = vadd.f32 %v3005_v44, %v3004_v58 }
0x17dd   :  { %v3007_v60 = vrot.slane %v3006_v59, 2 }
0x17df   :  { %v3008_v61 = vadd.f32 %v3007_v60, %v3006_v59 }
0x17e1   :  { %v3009_v62 = vrot.slane %v3008_v61, 1 }
0x17e3   :  { %v3010_v63 = vadd.f32 %v3009_v62, %v3008_v61 }
0x17e5   :  { %v3012_v1 = vmul.f32 0.0625, %v3010_v63 }
0x17e7   :  { %v3013_v2 = vmul.f32 %v3012_v1, %v2946_v0 }
0x17e9   :  { %v3015_v3 = vsel %vm3014_vm13, %v3013_v2, 0.0 }
0x17ea   :  { %3016 = vadd.xlane.f32.xlu1 %v3015_v3 }
0x1877   :  { %v3017_v5 = vpop.xlane.xlu1 %3016 }
0x1878   :  { %v3018_v6 = vadd.f32 %v3017_v5, %v2947_v4 }
0x187a   :  { %v3135_v7 = vmul.f32 -1.442695, %v3018_v6 }
0x187c   :  { %3883 = vpow2.f32 %v3135_v7 }
0x1886   :  { %v3884_v8 = vpop.eup %3883 }
0x1887   :  { %v3022_v9 = vadd.f32 1.0, %v3884_v8 }
0x1889   :  { %3885 = vrcp.f32 %v3022_v9 }
0x1893   :  { %v3886_v10 = vpop.eup %3885 }
0x1894   :  { %3026 = vst.msk [vmem:[#allocation5] sm:$0x1] %vm3025_vm3, %v3886_v10 }
0x1895   :  { %3920 = shalt.err (!%p3917_p12)
}
0x1896   :  { %s3921_s15 = scalar_lea.hbm %s4373_s3, 16 }
0x1897   :  { %p3922_p13 = scmp.ne.s32.totalorder %s4373_s3, %s3921_s15  ;;  %p3925_p0 = scmp.lt.u32.totalorder %s3921_s15, %s4373_s3 }
0x1899   :  { %p3927_p1 = pnand %p3925_p0, %p3922_p13 }
0x189b   :  { %3930 = shalt.err (!%p3927_p1)
}
0x189c   :  { %3036 = dma.vmem_to_hbm [thread:$0]  %s3034_s10, 16, %s4373_s3, [#allocation4]  }
0x189d   :  { %3933 = dma.done.wait [#allocation4], 16  }
0x189e   :  { %3934 = vsyncadd [#allocation4], 4294967280 }
0x189f   :  { %3040 = vsyncpa [#allocation3], 1 }
0x18a0   :  { %3041 = vsyncpa [#allocation4], 1 }

</bundles_post_ra>
